<compile_context>
chip_gen: v6e
topology: v6e:2x2x1
jax: 0.10.0
libtpu: 0.0.40
codegen_flags: <defaults>
</compile_context>

<pallas_src>
import functools

import jax
import jax.numpy as jnp
from jax.experimental import pallas as pl
from jax.experimental.pallas import tpu as pltpu

Z_DIM = 100
H1 = 256
H2 = 512
OUT = 28 * 28          # 784


def _round_up(n, m):
    return (n + m - 1) // m * m


def _choose_tb(batch, tb_max):
    """Pick a batch tile: multiple of 8, <= tb_max, >=2 tiles when batch allows
    (keeps both v7x TensorCores busy), and sized to ~ceil(batch/n_tiles) so the
    final (masked) tile overhangs by at most one 8-row sublane."""
    rows = _round_up(batch, 8)
    n_tiles = max(pl.cdiv(rows, tb_max), 1)
    if rows >= 16:
        n_tiles = max(n_tiles, 2)
    return _round_up(pl.cdiv(rows, n_tiles), 8)


def generator_kernel(x_ref, w1_ref, b1_ref, w2_ref, b2_ref, w3_ref, b3_ref, o_ref):
    """Fused Linear->ReLU->Linear->ReLU->Linear->Tanh for one (TB, ...) batch tile.

    Weights / MXU inputs are bf16, accumulation + bias + ReLU + tanh are f32,
    the result is cast to bf16 only at the output store.
    """
    x = x_ref[...].astype(jnp.bfloat16)                                  # (TB, 100)
    h1 = jnp.dot(x, w1_ref[...], preferred_element_type=jnp.float32) + b1_ref[...]
    h1 = jnp.maximum(h1, 0.0)                                            # ReLU (f32)
    h2 = jnp.dot(h1.astype(jnp.bfloat16), w2_ref[...],
                 preferred_element_type=jnp.float32) + b2_ref[...]
    h2 = jnp.maximum(h2, 0.0)                                            # ReLU (f32)
    h3 = jnp.dot(h2.astype(jnp.bfloat16), w3_ref[...],
                 preferred_element_type=jnp.float32) + b3_ref[...]
    o_ref[...] = jnp.tanh(h3).astype(jnp.bfloat16)                       # Tanh (f32 EUP) -> bf16 store


@functools.partial(jax.jit, static_argnames=("tb",))
def generator_forward(x, params, tb=512):
    """x: (B, 100) float32 -> (B, 28, 28) bfloat16.

    `params` must come from `prepare_params` (bf16 weights, f32 biases).
    The output is bf16 to halve the dominant HBM writeback stream; cast
    downstream if f32 is required.
    """
    w1, b1, w2, b2, w3, b3 = params
    B = x.shape[0]

    tb_eff = _choose_tb(B, tb)
    grid = (pl.cdiv(B, tb_eff),)          # last tile may overhang: OOB rows masked

    # Constant block index -> weight/bias blocks stay resident in VMEM.
    const = lambda shape: pl.BlockSpec(shape, lambda i: (0, 0))

    out_flat = pl.pallas_call(
        generator_kernel,
        out_shape=jax.ShapeDtypeStruct((B, OUT), jnp.bfloat16),
        grid=grid,
        in_specs=[
            pl.BlockSpec((tb_eff, Z_DIM), lambda i: (i, 0)),   # x tile (pipelined)
            const((Z_DIM, H1)), const((1, H1)),
            const((H1, H2)), const((1, H2)),
            const((H2, OUT)), const((1, OUT)),
        ],
        out_specs=pl.BlockSpec((tb_eff, OUT), lambda i: (i, 0)),
        compiler_params=pltpu.CompilerParams(
            dimension_semantics=("parallel",),     # shard batch tiles across TCs (v7x)
            vmem_limit_bytes=32 * 1024 * 1024),
    )(x, w1, b1, w2, b2, w3, b3)

    # Row-major contiguous reshape only (no data movement): matches x.view(-1, 28, 28).
    return out_flat.reshape(-1, 28, 28)


def init_params(key):
    """Deterministic synthetic f32 parameters (PyTorch-Linear-like scaling)."""
    ks = jax.random.split(key, 6)

    def linear(kw, kb, fan_in, fan_out):
        bound = 1.0 / jnp.sqrt(fan_in)
        w = jax.random.uniform(kw, (fan_in, fan_out), jnp.float32, -bound, bound)
        b = jax.random.uniform(kb, (1, fan_out), jnp.float32, -bound, bound)
        return w, b

    w1, b1 = linear(ks[0], ks[1], Z_DIM, H1)
    w2, b2 = linear(ks[2], ks[3], H1, H2)
    w3, b3 = linear(ks[4], ks[5], H2, OUT)
    return (w1, b1, w2, b2, w3, b3)


def prepare_params(params):
    """Cast weights to bf16 (MXU-native, halves weight HBM traffic); biases stay f32."""
    w1, b1, w2, b2, w3, b3 = params
    return (w1.astype(jnp.bfloat16), b1,
            w2.astype(jnp.bfloat16), b2,
            w3.astype(jnp.bfloat16), b3)


def _reference_bf16_math(x, params):
    """Same bf16-weight / f32-accumulate math as the kernel, in plain JAX (f32 out)."""
    w1, b1, w2, b2, w3, b3 = params
    xb = x.astype(jnp.bfloat16)
    r1 = jnp.maximum(jnp.dot(xb, w1, preferred_element_type=jnp.float32) + b1, 0.0)
    r2 = jnp.maximum(jnp.dot(r1.astype(jnp.bfloat16), w2,
                             preferred_element_type=jnp.float32) + b2, 0.0)
    r3 = jnp.tanh(jnp.dot(r2.astype(jnp.bfloat16), w3,
                          preferred_element_type=jnp.float32) + b3)
    return r3.reshape(-1, 28, 28)


if __name__ == "__main__":
    key = jax.random.PRNGKey(0)
    k_params, k_x1, k_x2 = jax.random.split(key, 3)

    params_f32 = init_params(k_params)
    params = prepare_params(params_f32)

    # --- Test 1: small batch, single exact tile ---------------------------------
    B1 = 8
    x1 = jax.random.normal(k_x1, (B1, Z_DIM), jnp.float32)
    out1 = generator_forward(x1, params)
    jax.block_until_ready(out1)
    assert out1.shape == (B1, 28, 28)
    assert out1.dtype == jnp.bfloat16

    ref1 = _reference_bf16_math(x1, params)
    assert jnp.allclose(out1.astype(jnp.float32), ref1, atol=1e-2, rtol=1e-2)

    # Original all-f32 module semantics (loose check: bf16 weights + bf16 output).
    w1f, b1f, w2f, b2f, w3f, b3f = params_f32
    ref1_f32 = jnp.tanh(
        jnp.maximum(jnp.maximum(x1 @ w1f + b1f, 0.0) @ w2f + b2f, 0.0) @ w3f + b3f
    ).reshape(-1, 28, 28)
    assert float(jnp.max(jnp.abs(out1.astype(jnp.float32) - ref1_f32))) < 1e-1

    # --- Test 2: multi-tile grid with a ragged (OOB-masked) final tile ----------
    B2 = 40                                  # -> 2 tiles of 24 rows, last overhangs by 8
    x2 = jax.random.normal(k_x2, (B2, Z_DIM), jnp.float32)
    out2 = generator_forward(x2, params)
    jax.block_until_ready(out2)
    assert out2.shape == (B2, 28, 28)

    ref2 = _reference_bf16_math(x2, params)
    assert jnp.allclose(out2.astype(jnp.float32), ref2, atol=1e-2, rtol=1e-2)

    print("KERNEL_OK")
</pallas_src>

<mosaic_0001>
module attributes {stable_mosaic.version = 11 : i64} {
  func.func @generator_kernel(%arg0: i32, %arg1: memref<8x100xf32, #tpu.memory_space<vmem>>, %arg2: memref<100x256xbf16, #tpu.memory_space<vmem>>, %arg3: memref<1x256xf32, #tpu.memory_space<vmem>>, %arg4: memref<256x512xbf16, #tpu.memory_space<vmem>>, %arg5: memref<1x512xf32, #tpu.memory_space<vmem>>, %arg6: memref<512x784xbf16, #tpu.memory_space<vmem>>, %arg7: memref<1x784xf32, #tpu.memory_space<vmem>>, %arg8: memref<8x784xbf16, #tpu.memory_space<vmem>>) attributes {dimension_semantics = [#tpu.dimension_semantics<parallel>], iteration_bounds = array<i64: 1>, scalar_prefetch = 0 : i64, scratch_operands = 0 : i64, tpu.core_type = #tpu.core_type<tc>, window_params = [{transform_indices = @transform_0, window_bounds = array<i64: 8, 100>}, {pipeline_mode = #tpu.pipeline_mode<synchronous>, transform_indices = @transform_1, window_bounds = array<i64: 100, 256>}, {pipeline_mode = #tpu.pipeline_mode<synchronous>, transform_indices = @transform_2, window_bounds = array<i64: 1, 256>}, {pipeline_mode = #tpu.pipeline_mode<synchronous>, transform_indices = @transform_3, window_bounds = array<i64: 256, 512>}, {pipeline_mode = #tpu.pipeline_mode<synchronous>, transform_indices = @transform_4, window_bounds = array<i64: 1, 512>}, {pipeline_mode = #tpu.pipeline_mode<synchronous>, transform_indices = @transform_5, window_bounds = array<i64: 512, 784>}, {pipeline_mode = #tpu.pipeline_mode<synchronous>, transform_indices = @transform_6, window_bounds = array<i64: 1, 784>}, {transform_indices = @transform_7, window_bounds = array<i64: 8, 784>}]} {
    %c0 = arith.constant 0 : index
    %c0_0 = arith.constant 0 : index
    %0 = vector.load %arg1[%c0, %c0_0] : memref<8x100xf32, #tpu.memory_space<vmem>>, vector<8x100xf32>
    %1 = arith.truncf %0 : vector<8x100xf32> to vector<8x100xbf16>
    %c0_1 = arith.constant 0 : index
    %c0_2 = arith.constant 0 : index
    %2 = vector.load %arg2[%c0_1, %c0_2] : memref<100x256xbf16, #tpu.memory_space<vmem>>, vector<100x256xbf16>
    %cst = arith.constant dense<0.000000e+00> : vector<8x256xf32>
    %3 = tpu.matmul %1, %2, %cst {dimension_numbers = #tpu.dot_dimension_numbers<[1], [0], [0], [1], [0, 0, 1, 1], [], []>} : vector<8x100xbf16>, vector<100x256xbf16>, vector<8x256xf32> -> vector<8x256xf32>
    %c0_3 = arith.constant 0 : index
    %c0_4 = arith.constant 0 : index
    %4 = vector.load %arg3[%c0_3, %c0_4] : memref<1x256xf32, #tpu.memory_space<vmem>>, vector<1x256xf32>
    %5 = vector.broadcast %4 : vector<1x256xf32> to vector<8x256xf32>
    %6 = arith.addf %3, %5 : vector<8x256xf32>
    %cst_5 = arith.constant 0.000000e+00 : f32
    %7 = vector.broadcast %cst_5 : f32 to vector<8x256xf32>
    %8 = arith.maximumf %6, %7 : vector<8x256xf32>
    %9 = arith.truncf %8 : vector<8x256xf32> to vector<8x256xbf16>
    %c0_6 = arith.constant 0 : index
    %c0_7 = arith.constant 0 : index
    %10 = vector.load %arg4[%c0_6, %c0_7] : memref<256x512xbf16, #tpu.memory_space<vmem>>, vector<256x512xbf16>
    %cst_8 = arith.constant dense<0.000000e+00> : vector<8x512xf32>
    %11 = tpu.matmul %9, %10, %cst_8 {dimension_numbers = #tpu.dot_dimension_numbers<[1], [0], [0], [1], [0, 0, 1, 1], [], []>} : vector<8x256xbf16>, vector<256x512xbf16>, vector<8x512xf32> -> vector<8x512xf32>
    %c0_9 = arith.constant 0 : index
    %c0_10 = arith.constant 0 : index
    %12 = vector.load %arg5[%c0_9, %c0_10] : memref<1x512xf32, #tpu.memory_space<vmem>>, vector<1x512xf32>
    %13 = vector.broadcast %12 : vector<1x512xf32> to vector<8x512xf32>
    %14 = arith.addf %11, %13 : vector<8x512xf32>
    %cst_11 = arith.constant 0.000000e+00 : f32
    %15 = vector.broadcast %cst_11 : f32 to vector<8x512xf32>
    %16 = arith.maximumf %14, %15 : vector<8x512xf32>
    %17 = arith.truncf %16 : vector<8x512xf32> to vector<8x512xbf16>
    %c0_12 = arith.constant 0 : index
    %c0_13 = arith.constant 0 : index
    %18 = vector.load %arg6[%c0_12, %c0_13] : memref<512x784xbf16, #tpu.memory_space<vmem>>, vector<512x784xbf16>
    %cst_14 = arith.constant dense<0.000000e+00> : vector<8x784xf32>
    %19 = tpu.matmul %17, %18, %cst_14 {dimension_numbers = #tpu.dot_dimension_numbers<[1], [0], [0], [1], [0, 0, 1, 1], [], []>} : vector<8x512xbf16>, vector<512x784xbf16>, vector<8x784xf32> -> vector<8x784xf32>
    %c0_15 = arith.constant 0 : index
    %c0_16 = arith.constant 0 : index
    %20 = vector.load %arg7[%c0_15, %c0_16] : memref<1x784xf32, #tpu.memory_space<vmem>>, vector<1x784xf32>
    %21 = vector.broadcast %20 : vector<1x784xf32> to vector<8x784xf32>
    %22 = arith.addf %19, %21 : vector<8x784xf32>
    %23 = math.tanh %22 : vector<8x784xf32>
    %24 = arith.truncf %23 : vector<8x784xf32> to vector<8x784xbf16>
    %c0_17 = arith.constant 0 : index
    %c0_18 = arith.constant 0 : index
    %25 = vector.load %arg8[%c0_17, %c0_18] : memref<8x784xbf16, #tpu.memory_space<vmem>>, vector<8x784xbf16>
    tpu.vector_store %arg8[%c0_17, %c0_18], %24 {strides = array<i32>} : memref<8x784xbf16, #tpu.memory_space<vmem>>, vector<8x784xbf16>,
    return
  }
  func.func @transform_0(%arg0: i32) -> (i32, i32) {
    %c0_i32 = arith.constant 0 : i32
    %c0_i32_0 = arith.constant 0 : i32
    return %arg0, %c0_i32 : i32, i32
  }
  func.func @transform_1(%arg0: i32) -> (i32, i32) {
    %c0_i32 = arith.constant 0 : i32
    %c0_i32_0 = arith.constant 0 : i32
    %c0_i32_1 = arith.constant 0 : i32
    return %c0_i32, %c0_i32_0 : i32, i32
  }
  func.func @transform_2(%arg0: i32) -> (i32, i32) {
    %c0_i32 = arith.constant 0 : i32
    %c0_i32_0 = arith.constant 0 : i32
    %c0_i32_1 = arith.constant 0 : i32
    return %c0_i32, %c0_i32_0 : i32, i32
  }
  func.func @transform_3(%arg0: i32) -> (i32, i32) {
    %c0_i32 = arith.constant 0 : i32
    %c0_i32_0 = arith.constant 0 : i32
    %c0_i32_1 = arith.constant 0 : i32
    return %c0_i32, %c0_i32_0 : i32, i32
  }
  func.func @transform_4(%arg0: i32) -> (i32, i32) {
    %c0_i32 = arith.constant 0 : i32
    %c0_i32_0 = arith.constant 0 : i32
    %c0_i32_1 = arith.constant 0 : i32
    return %c0_i32, %c0_i32_0 : i32, i32
  }
  func.func @transform_5(%arg0: i32) -> (i32, i32) {
    %c0_i32 = arith.constant 0 : i32
    %c0_i32_0 = arith.constant 0 : i32
    %c0_i32_1 = arith.constant 0 : i32
    return %c0_i32, %c0_i32_0 : i32, i32
  }
  func.func @transform_6(%arg0: i32) -> (i32, i32) {
    %c0_i32 = arith.constant 0 : i32
    %c0_i32_0 = arith.constant 0 : i32
    %c0_i32_1 = arith.constant 0 : i32
    return %c0_i32, %c0_i32_0 : i32, i32
  }
  func.func @transform_7(%arg0: i32) -> (i32, i32) {
    %c0_i32 = arith.constant 0 : i32
    %c0_i32_0 = arith.constant 0 : i32
    return %arg0, %c0_i32 : i32, i32
  }
}

</mosaic_0001>

<bundles_post_ra>
// kernel: generator_forward.1
= control target key start
LH: loop header
LB: loop body
LE: loop exit
PB: predicated region body
PF: predicated region fallthrough
CT: control target
= control target key end

     0   :  { %vm123_vm0 = vcmask 1041408   ;;  %v3294_v1 = vmov 0   ;;  %vm119_vm1 = vcmask 818176   ;;  %vm2481_vm2 = vcmask 125952   ;;  %s4322_s1 = inlined_call_operand.vmem [shape: bf16[100,256], index: 1, kind: input, shape index: {}]   ;;  %s4323_s3 = inlined_call_operand.vmem [shape: bf16[256,512], index: 3, kind: input, shape index: {}]   ;;  %s4324_s0 = inlined_call_operand.vmem [shape: f32[8,100], index: 0, kind: input, shape index: {}]   ;;  %s4325_s5 = inlined_call_operand.vmem [shape: bf16[512,784], index: 5, kind: input, shape index: {}]   ;;  %s4326_s2 = inlined_call_operand.vmem [shape: f32[1,256], index: 2, kind: input, shape index: {}]   ;;  %s4327_s4 = inlined_call_operand.vmem [shape: f32[1,512], index: 4, kind: input, shape index: {}]   ;;  %s4328_s6 = inlined_call_operand.vmem [shape: f32[1,784], index: 6, kind: input, shape index: {}]   ;;  %s4329_s7 = inlined_call_operand.vmem [shape: bf16[8,784], index: 7, kind: output, shape index: {}]  }
   0x1   :  { %v41_v0 = vld [vmem:[%s4322_s1 + $0x60] sm:$0x33]  ;;  %162 = vmatprep.mubr.bf16.mxu0 %v3294_v1  ;;  %v2846_v4 = vld [vmem:[%s4322_s1 + $0x54] ss:$8 sps:$4 sm:$0xff]   ;;  %v2848_v6 = vld [vmem:[%s4322_s1 + $0x50] ss:$8 sps:$4 sm:$0xff]  }
   0x2   :  { %v2500_v2 = vcombine.high %v41_v0, %v41_v0  ;;  %v2499_v3 = vcombine.low %v41_v0, %v41_v0  ;;  %v2849_v7 = vld [vmem:[%s4322_s1 + $0x44] ss:$8 sps:$4 sm:$0xff]   ;;  %v2851_v8 = vld [vmem:[%s4322_s1 + $0x40] ss:$8 sps:$4 sm:$0xff]   ;;  %v2852_v9 = vld [vmem:[%s4322_s1 + $0x34] ss:$8 sps:$4 sm:$0xff]  }
   0x3   :  { %v2864_v10 = vld [vmem:[%s4323_s3 + $0xe4] ss:$16 sps:$4 sm:$0xff]   ;;  %v2854_v11 = vld [vmem:[%s4322_s1 + $0x30] ss:$8 sps:$4 sm:$0xff]   ;;  %v2857_v17 = vld [vmem:[%s4322_s1 + $0x20] ss:$8 sps:$4 sm:$0xff]  }
   0x4   :  { %2501 = vmatprep.subr.msk.bf16.mxu0 %vm123_vm0, %v2500_v2  ;;  %v125_v5 = vsel %vm123_vm0, %v2499_v3, 0  ;;  %581 = vmatprep.subr.bf16.mxu1 %v2864_v10  ;;  %v2869_v12 = vld [vmem:[%s4323_s3 + $0xe0] ss:$16 sps:$4 sm:$0xff]   ;;  %v2870_v13 = vld [vmem:[%s4323_s3 + $0xc4] ss:$16 sps:$4 sm:$0xff]  }
   0x5   :  { %133 = vmatpush1.bf16.msra.mxu0 %v125_v5  ;;  %v2855_v14 = vld [vmem:[%s4322_s1 + $0x24] ss:$8 sps:$4 sm:$0xff]   ;;  %582 = vmatpush1.bf16.msra.mxu1 %v2869_v12  ;;  %v2875_v15 = vld [vmem:[%s4323_s3 + $0xc0] ss:$16 sps:$4 sm:$0xff]   ;;  %v2858_v18 = vld [vmem:[%s4322_s1 + $0x14] ss:$8 sps:$4 sm:$0xff]  }
   0x6   :  { %134 = vmatprep.subr.bf16.mxu0 %v2846_v4  ;;  %583 = vmatprep.subr.bf16.mxu1 %v2870_v13  ;;  %v2876_v16 = vld [vmem:[%s4323_s3 + $0xa4] ss:$16 sps:$4 sm:$0xff]   ;;  %v2881_v19 = vld [vmem:[%s4323_s3 + $0xa0] ss:$16 sps:$4 sm:$0xff]   ;;  %v2868_v27 = vld [vmem:[%s4323_s3 + $0xec] ss:$16 sps:$4 sm:$0xff]  }
   0x7   :  { %v2882_v20 = vld [vmem:[%s4323_s3 + $0x84] ss:$16 sps:$4 sm:$0xff]   ;;  %v2860_v21 = vld [vmem:[%s4322_s1 + $0x10] ss:$8 sps:$4 sm:$0xff]   ;;  %v2863_v25 = vld [vmem:[%s4322_s1] ss:$8 sps:$4 sm:$0xff]  }
   0x8   :  { %v2861_v22 = vld [vmem:[%s4322_s1 + $0x4] ss:$8 sps:$4 sm:$0xff]   ;;  %v2887_v23 = vld [vmem:[%s4323_s3 + $0x80] ss:$16 sps:$4 sm:$0xff]   ;;  %v2866_v31 = vld [vmem:[%s4323_s3 + $0xe8] ss:$16 sps:$4 sm:$0xff]  }
   0x9   :  { %135 = vmatpush1.bf16.msra.mxu0 %v2848_v6  ;;  %584 = vmatpush1.bf16.msra.mxu1 %v2875_v15  ;;  %v2888_v24 = vld [vmem:[%s4323_s3 + $0x64] ss:$16 sps:$4 sm:$0xff]   ;;  %v2893_v28 = vld [vmem:[%s4323_s3 + $0x60] ss:$16 sps:$4 sm:$0xff]   ;;  %v2874_v32 = vld [vmem:[%s4323_s3 + $0xcc] ss:$16 sps:$4 sm:$0xff]  }
   0xa   :  { %136 = vmatprep.subr.bf16.mxu0 %v2849_v7  ;;  %585 = vmatprep.subr.bf16.mxu1 %v2876_v16  ;;  %v27_v26 = vld [vmem:[%s4324_s0] sm:$0xff]  ;;  %v2872_v35 = vld [vmem:[%s4323_s3 + $0xc8] ss:$16 sps:$4 sm:$0xff]   ;;  %v2880_v36 = vld [vmem:[%s4323_s3 + $0xac] ss:$16 sps:$4 sm:$0xff]  }
   0xb   :  { %v2894_v29 = vld [vmem:[%s4323_s3 + $0x44] ss:$16 sps:$4 sm:$0xff]   ;;  %v28_v30 = vpack.c.bf16 %v27_v26, %v27_v26  ;;  %v2899_v33 = vld [vmem:[%s4323_s3 + $0x40] ss:$16 sps:$4 sm:$0xff]   ;;  %v2878_v39 = vld [vmem:[%s4323_s3 + $0xa8] ss:$16 sps:$4 sm:$0xff]  }
   0xc   :  { %v2900_v34 = vld [vmem:[%s4323_s3 + $0x24] ss:$16 sps:$4 sm:$0xff]   ;;  %v2905_v37 = vld [vmem:[%s4323_s3 + $0x20] ss:$16 sps:$4 sm:$0xff]   ;;  %v2886_v40 = vld [vmem:[%s4323_s3 + $0x8c] ss:$16 sps:$4 sm:$0xff]  }
   0xd   :  { %137 = vmatpush1.bf16.msra.mxu0 %v2851_v8  ;;  %586 = vmatpush1.bf16.msra.mxu1 %v2881_v19  ;;  %v2906_v38 = vld [vmem:[%s4323_s3 + $0x4] ss:$16 sps:$4 sm:$0xff]   ;;  %v2911_v41 = vld [vmem:[%s4323_s3] ss:$16 sps:$4 sm:$0xff]   ;;  %v2884_v43 = vld [vmem:[%s4323_s3 + $0x88] ss:$16 sps:$4 sm:$0xff]  }
   0xe   :  { %138 = vmatprep.subr.bf16.mxu0 %v2852_v9  ;;  %587 = vmatprep.subr.bf16.mxu1 %v2882_v20  ;;  %v2912_v42 = vld [vmem:[%s4323_s3 + $0x1e4] ss:$16 sps:$4 sm:$0xff]   ;;  %v2892_v44 = vld [vmem:[%s4323_s3 + $0x6c] ss:$16 sps:$4 sm:$0xff]   ;;  %v2917_v45 = vld [vmem:[%s4323_s3 + $0x1e0] ss:$16 sps:$4 sm:$0xff]  }
   0xf   :  { %v2918_v46 = vld [vmem:[%s4323_s3 + $0x1c4] ss:$16 sps:$4 sm:$0xff]   ;;  %v2890_v47 = vld [vmem:[%s4323_s3 + $0x68] ss:$16 sps:$4 sm:$0xff]   ;;  %v2898_v48 = vld [vmem:[%s4323_s3 + $0x4c] ss:$16 sps:$4 sm:$0xff]  }
  0x10   :  { %v2923_v49 = vld [vmem:[%s4323_s3 + $0x1c0] ss:$16 sps:$4 sm:$0xff]   ;;  %v2896_v50 = vld [vmem:[%s4323_s3 + $0x48] ss:$16 sps:$4 sm:$0xff]   ;;  %v2924_v51 = vld [vmem:[%s4323_s3 + $0x1a4] ss:$16 sps:$4 sm:$0xff]  }
  0x11   :  { %139 = vmatpush1.bf16.msra.mxu0 %v2854_v11  ;;  %588 = vmatpush1.bf16.msra.mxu1 %v2887_v23  ;;  %v2904_v52 = vld [vmem:[%s4323_s3 + $0x2c] ss:$16 sps:$4 sm:$0xff]   ;;  %v2929_v53 = vld [vmem:[%s4323_s3 + $0x1a0] ss:$16 sps:$4 sm:$0xff]   ;;  %v2930_v54 = vld [vmem:[%s4323_s3 + $0x184] ss:$16 sps:$4 sm:$0xff]  }
  0x12   :  { %140 = vmatprep.subr.bf16.mxu0 %v2855_v14  ;;  %589 = vmatprep.subr.bf16.mxu1 %v2888_v24  ;;  %v2902_v55 = vld [vmem:[%s4323_s3 + $0x28] ss:$16 sps:$4 sm:$0xff]   ;;  %v2910_v56 = vld [vmem:[%s4323_s3 + $0xc] ss:$16 sps:$4 sm:$0xff]   ;;  %v2935_v57 = vld [vmem:[%s4323_s3 + $0x180] ss:$16 sps:$4 sm:$0xff]  }
  0x13   :  { %v2936_v58 = vld [vmem:[%s4323_s3 + $0x164] ss:$16 sps:$4 sm:$0xff]   ;;  %v2908_v59 = vld [vmem:[%s4323_s3 + $0x8] ss:$16 sps:$4 sm:$0xff]   ;;  %v2916_v60 = vld [vmem:[%s4323_s3 + $0x1ec] ss:$16 sps:$4 sm:$0xff]  }
  0x14   :  { %v2941_v61 = vld [vmem:[%s4323_s3 + $0x160] ss:$16 sps:$4 sm:$0xff]   ;;  %v2942_v62 = vld [vmem:[%s4323_s3 + $0x144] ss:$16 sps:$4 sm:$0xff]   ;;  %v2914_v63 = vld [vmem:[%s4323_s3 + $0x1e8] ss:$16 sps:$4 sm:$0xff]  }
  0x15   :  { %141 = vmatpush1.bf16.msra.mxu0 %v2857_v17  ;;  %590 = vmatpush1.bf16.msra.mxu1 %v2893_v28  ;;  %v2922_v0 = vld [vmem:[%s4323_s3 + $0x1cc] ss:$16 sps:$4 sm:$0xff]   ;;  %v2947_v1 = vld [vmem:[%s4323_s3 + $0x140] ss:$16 sps:$4 sm:$0xff]   ;;  %v2920_v2 = vld [vmem:[%s4323_s3 + $0x1c8] ss:$16 sps:$4 sm:$0xff]  }
  0x16   :  { %142 = vmatprep.subr.bf16.mxu0 %v2858_v18  ;;  %591 = vmatprep.subr.bf16.mxu1 %v2894_v29  ;;  %v2928_v3 = vld [vmem:[%s4323_s3 + $0x1ac] ss:$16 sps:$4 sm:$0xff]   ;;  %v2926_v4 = vld [vmem:[%s4323_s3 + $0x1a8] ss:$16 sps:$4 sm:$0xff]   ;;  %v2948_v11 = vld [vmem:[%s4323_s3 + $0x124] ss:$16 sps:$4 sm:$0xff]  }
  0x17   :  { %v2934_v5 = vld [vmem:[%s4323_s3 + $0x18c] ss:$16 sps:$4 sm:$0xff]   ;;  %v2932_v6 = vld [vmem:[%s4323_s3 + $0x188] ss:$16 sps:$4 sm:$0xff]   ;;  %v2953_v14 = vld [vmem:[%s4323_s3 + $0x120] ss:$16 sps:$4 sm:$0xff]  }
  0x18   :  { %v2940_v7 = vld [vmem:[%s4323_s3 + $0x16c] ss:$16 sps:$4 sm:$0xff]   ;;  %v2938_v8 = vld [vmem:[%s4323_s3 + $0x168] ss:$16 sps:$4 sm:$0xff]   ;;  %v2954_v15 = vld [vmem:[%s4323_s3 + $0x104] ss:$16 sps:$4 sm:$0xff]  }
  0x19   :  { %143 = vmatpush1.bf16.msra.mxu0 %v2860_v21  ;;  %592 = vmatpush1.bf16.msra.mxu1 %v2899_v33  ;;  %v2946_v9 = vld [vmem:[%s4323_s3 + $0x14c] ss:$16 sps:$4 sm:$0xff]   ;;  %v2944_v10 = vld [vmem:[%s4323_s3 + $0x148] ss:$16 sps:$4 sm:$0xff]   ;;  %v2959_v18 = vld [vmem:[%s4323_s3 + $0x100] ss:$16 sps:$4 sm:$0xff]   ;;  %v44_v21 = vlaneseq }
  0x1a   :  { %144 = vmatprep.subr.bf16.mxu0 %v2861_v22  ;;  %593 = vmatprep.subr.bf16.mxu1 %v2900_v34  ;;  %v2952_v12 = vld [vmem:[%s4323_s3 + $0x12c] ss:$16 sps:$4 sm:$0xff]   ;;  %v2950_v13 = vld [vmem:[%s4323_s3 + $0x128] ss:$16 sps:$4 sm:$0xff]   ;;  %v42_v24 = vld [vmem:[%s4326_s2] sm:$0x3] }
  0x1b   :  { %v2958_v16 = vld [vmem:[%s4323_s3 + $0x10c] ss:$16 sps:$4 sm:$0xff]   ;;  %v2956_v17 = vld [vmem:[%s4323_s3 + $0x108] ss:$16 sps:$4 sm:$0xff]   ;;  %v3575_v22 = vshrl.u32 %v44_v21, 7 }
  0x1c   :  { %v2962_v19 = vld [vmem:[%s4325_s5 + $0x18c] ss:$28 sps:$4 sm:$0xff]  }
  0x1d   :  { %145 = vmatpush1.bf16.msra.mxu0 %v2863_v25  ;;  %594 = vmatpush1.bf16.msra.mxu1 %v2905_v37  ;;  %v2965_v20 = vld [vmem:[%s4325_s5 + $0x50c] ss:$28 sps:$4 sm:$0xff]   ;;  %v3578_v23 = vsub.s32 0, %v3575_v22  ;;  %v3584_v25 = vsub.s32 1, %v3575_v22 }
  0x1e   :  { %622 = vmatprep.subr.bf16.mxu0 %v2868_v27  ;;  %595 = vmatprep.subr.bf16.mxu1 %v2906_v38  ;;  %v2960_v37 = vld [vmem:[%s4325_s5 + $0x188] ss:$28 sps:$4 sm:$0xff]  }
  0x1f   :  { %v47_v26 = vrot.slane %v42_v24, %v3578_v23  ;;  %v51_v27 = vrot.slane %v42_v24, %v3584_v25  ;;  %v2963_v38 = vld [vmem:[%s4325_s5 + $0x508] ss:$28 sps:$4 sm:$0xff]  }
  0x20   :  { %2502 = vmatmul.mubr.msk.bf16.vlgmr.msra.gmra.mxu0 %vm119_vm1, %v28_v30  ;;  %v3037_v21 = vld [vmem:[%s4325_s5 + $0x5ec] ss:$28 sps:$4 sm:$0xff]  }
  0x21   :  { %623 = vmatpush1.bf16.msra.mxu0 %v2866_v31  ;;  %596 = vmatpush1.bf16.msra.mxu1 %v2911_v41  ;;  %v2971_v41 = vld [vmem:[%s4325_s5 + $0x4d4] ss:$28 sps:$4 sm:$0xff]   ;;  %v3032_v24 = vld [vmem:[%s4325_s5 + $0x268] ss:$28 sps:$4 sm:$0xff]  }
  0x22   :  { %624 = vmatprep.subr.bf16.mxu0 %v2874_v32  ;;  %597 = vmatprep.subr.bf16.mxu1 %v2912_v42  ;;  %v2966_v42 = vld [vmem:[%s4325_s5 + $0x150] ss:$28 sps:$4 sm:$0xff]  }
  0x25   :  { %625 = vmatpush1.bf16.msra.mxu0 %v2872_v35  ;;  %598 = vmatpush2.bf16.msra.mxu1 %v2917_v45  ;;  %v2977_v45 = vld [vmem:[%s4325_s5 + $0x49c] ss:$28 sps:$4 sm:$0xff]  }
  0x26   :  { %626 = vmatprep.subr.bf16.mxu0 %v2880_v36  ;;  %599 = vmatprep.subr.bf16.mxu1 %v2918_v46  ;;  %v2972_v46 = vld [vmem:[%s4325_s5 + $0x118] ss:$28 sps:$4 sm:$0xff]  }
  0x29   :  { %627 = vmatpush1.bf16.msra.mxu0 %v2878_v39  ;;  %600 = vmatpush2.bf16.msra.mxu1 %v2923_v49  ;;  %v2983_v49 = vld [vmem:[%s4325_s5 + $0x464] ss:$28 sps:$4 sm:$0xff]  }
  0x2a   :  { %628 = vmatprep.subr.bf16.mxu0 %v2886_v40  ;;  %601 = vmatprep.subr.bf16.mxu1 %v2924_v51  ;;  %v2968_v40 = vld [vmem:[%s4325_s5 + $0x154] ss:$28 sps:$4 sm:$0xff]   ;;  %v2981_v51 = vld [vmem:[%s4325_s5 + $0x460] ss:$28 sps:$4 sm:$0xff]  }
  0x2d   :  { %629 = vmatpush1.bf16.msra.mxu0 %v2884_v43  ;;  %602 = vmatpush2.bf16.msra.mxu1 %v2929_v53  ;;  %v2969_v43 = vld [vmem:[%s4325_s5 + $0x4d0] ss:$28 sps:$4 sm:$0xff]  }
  0x2e   :  { %630 = vmatprep.subr.bf16.mxu0 %v2892_v44  ;;  %603 = vmatprep.subr.bf16.mxu1 %v2930_v54  ;;  %v2974_v44 = vld [vmem:[%s4325_s5 + $0x11c] ss:$28 sps:$4 sm:$0xff]   ;;  %v2989_v53 = vld [vmem:[%s4325_s5 + $0x42c] ss:$28 sps:$4 sm:$0xff]  }
  0x2f   :  { %v2984_v54 = vld [vmem:[%s4325_s5 + $0xa8] ss:$28 sps:$4 sm:$0xff]  }
  0x31   :  { %631 = vmatpush1.bf16.msra.mxu0 %v2890_v47  ;;  %604 = vmatpush2.bf16.msra.mxu1 %v2935_v57  ;;  %v2975_v47 = vld [vmem:[%s4325_s5 + $0x498] ss:$28 sps:$4 sm:$0xff]  }
  0x32   :  { %632 = vmatprep.subr.bf16.mxu0 %v2898_v48  ;;  %605 = vmatprep.subr.bf16.mxu1 %v2936_v58  ;;  %v2980_v48 = vld [vmem:[%s4325_s5 + $0xe4] ss:$28 sps:$4 sm:$0xff]   ;;  %v2995_v57 = vld [vmem:[%s4325_s5 + $0x3f4] ss:$28 sps:$4 sm:$0xff]  }
  0x33   :  { %v2990_v58 = vld [vmem:[%s4325_s5 + $0x70] ss:$28 sps:$4 sm:$0xff]  }
  0x35   :  { %633 = vmatpush1.bf16.msra.mxu0 %v2896_v50  ;;  %606 = vmatpush2.bf16.msra.mxu1 %v2941_v61  ;;  %v2978_v50 = vld [vmem:[%s4325_s5 + $0xe0] ss:$28 sps:$4 sm:$0xff]  }
  0x36   :  { %634 = vmatprep.subr.bf16.mxu0 %v2904_v52  ;;  %607 = vmatprep.subr.bf16.mxu1 %v2942_v62  ;;  %v2986_v52 = vld [vmem:[%s4325_s5 + $0xac] ss:$28 sps:$4 sm:$0xff]   ;;  %v3001_v61 = vld [vmem:[%s4325_s5 + $0x3bc] ss:$28 sps:$4 sm:$0xff]  }
  0x37   :  { %v2996_v62 = vld [vmem:[%s4325_s5 + $0x38] ss:$28 sps:$4 sm:$0xff]  }
  0x39   :  { %635 = vmatpush1.bf16.msra.mxu0 %v2902_v55  ;;  %608 = vmatpush2.bf16.msra.mxu1 %v2947_v1  ;;  %v2987_v55 = vld [vmem:[%s4325_s5 + $0x428] ss:$28 sps:$4 sm:$0xff]  }
  0x3a   :  { %636 = vmatprep.subr.bf16.mxu0 %v2910_v56  ;;  %609 = vmatprep.subr.bf16.mxu1 %v2948_v11  ;;  %v2992_v56 = vld [vmem:[%s4325_s5 + $0x74] ss:$28 sps:$4 sm:$0xff]   ;;  %v3007_v1 = vld [vmem:[%s4325_s5 + $0x384] ss:$28 sps:$4 sm:$0xff]  }
  0x3b   :  { %v3017_v11 = vld [vmem:[%s4325_s5 + $0x690] ss:$28 sps:$4 sm:$0xff]  }
  0x3d   :  { %637 = vmatpush1.bf16.msra.mxu0 %v2908_v59  ;;  %610 = vmatpush2.bf16.msra.mxu1 %v2953_v14  ;;  %v2993_v59 = vld [vmem:[%s4325_s5 + $0x3f0] ss:$28 sps:$4 sm:$0xff]   ;;  %v3020_v14 = vld [vmem:[%s4325_s5 + $0x2d8] ss:$28 sps:$4 sm:$0xff]  }
  0x3e   :  { %638 = vmatprep.subr.bf16.mxu0 %v2916_v60  ;;  %611 = vmatprep.subr.bf16.mxu1 %v2954_v15  ;;  %v2998_v60 = vld [vmem:[%s4325_s5 + $0x3c] ss:$28 sps:$4 sm:$0xff]  }
  0x3f   :  { %v3023_v15 = vld [vmem:[%s4325_s5 + $0x658] ss:$28 sps:$4 sm:$0xff]  }
  0x41   :  { %639 = vmatpush2.bf16.msra.mxu0 %v2914_v63  ;;  %612 = vmatpush2.bf16.msra.mxu1 %v2959_v18  ;;  %v2999_v63 = vld [vmem:[%s4325_s5 + $0x3b8] ss:$28 sps:$4 sm:$0xff]   ;;  %v3026_v18 = vld [vmem:[%s4325_s5 + $0x2a0] ss:$28 sps:$4 sm:$0xff]  }
  0x42   :  { %640 = vmatprep.subr.bf16.mxu0 %v2922_v0  ;;  %2116 = vmatprep.subr.bf16.mxu1 %v2962_v19  ;;  %v3004_v0 = vld [vmem:[%s4325_s5 + $0x4] ss:$28 sps:$4 sm:$0xff]  }
  0x43   :  { %v3029_v19 = vld [vmem:[%s4325_s5 + $0x620] ss:$28 sps:$4 sm:$0xff]  }
  0x45   :  { %641 = vmatpush2.bf16.msra.mxu0 %v2920_v2  ;;  %v3002_v2 = vld [vmem:[%s4325_s5] ss:$28 sps:$4 sm:$0xff]  }
  0x46   :  { %642 = vmatprep.subr.bf16.mxu0 %v2928_v3  ;;  %v3005_v3 = vld [vmem:[%s4325_s5 + $0x380] ss:$28 sps:$4 sm:$0xff]  }
  0x49   :  { %643 = vmatpush2.bf16.msra.mxu0 %v2926_v4  ;;  %v3010_v4 = vld [vmem:[%s4325_s5 + $0x34c] ss:$28 sps:$4 sm:$0xff]  }
  0x4a   :  { %644 = vmatprep.subr.bf16.mxu0 %v2934_v5  ;;  %v3013_v5 = vld [vmem:[%s4325_s5 + $0x6cc] ss:$28 sps:$4 sm:$0xff]  }
  0x4d   :  { %645 = vmatpush2.bf16.msra.mxu0 %v2932_v6  ;;  %v3008_v6 = vld [vmem:[%s4325_s5 + $0x348] ss:$28 sps:$4 sm:$0xff]  }
  0x4e   :  { %646 = vmatprep.subr.bf16.mxu0 %v2940_v7  ;;  %v3011_v7 = vld [vmem:[%s4325_s5 + $0x6c8] ss:$28 sps:$4 sm:$0xff]  }
  0x51   :  { %647 = vmatpush2.bf16.msra.mxu0 %v2938_v8  ;;  %v3016_v8 = vld [vmem:[%s4325_s5 + $0x314] ss:$28 sps:$4 sm:$0xff]  }
  0x52   :  { %648 = vmatprep.subr.bf16.mxu0 %v2946_v9  ;;  %v3019_v9 = vld [vmem:[%s4325_s5 + $0x694] ss:$28 sps:$4 sm:$0xff]  }
  0x55   :  { %649 = vmatpush2.bf16.msra.mxu0 %v2944_v10  ;;  %v3014_v10 = vld [vmem:[%s4325_s5 + $0x310] ss:$28 sps:$4 sm:$0xff]  }
  0x56   :  { %650 = vmatprep.subr.bf16.mxu0 %v2952_v12  ;;  %v3022_v12 = vld [vmem:[%s4325_s5 + $0x2dc] ss:$28 sps:$4 sm:$0xff]  }
  0x59   :  { %651 = vmatpush2.bf16.msra.mxu0 %v2950_v13  ;;  %v3025_v13 = vld [vmem:[%s4325_s5 + $0x65c] ss:$28 sps:$4 sm:$0xff]  }
  0x5a   :  { %652 = vmatprep.subr.bf16.mxu0 %v2958_v16  ;;  %v3028_v16 = vld [vmem:[%s4325_s5 + $0x2a4] ss:$28 sps:$4 sm:$0xff]  }
  0x5d   :  { %653 = vmatpush2.bf16.msra.mxu0 %v2956_v17  ;;  %v3031_v17 = vld [vmem:[%s4325_s5 + $0x624] ss:$28 sps:$4 sm:$0xff]  }
  0x5e   :  { %2157 = vmatprep.subr.bf16.mxu0 %v2965_v20  ;;  %v3034_v20 = vld [vmem:[%s4325_s5 + $0x26c] ss:$28 sps:$4 sm:$0xff]  }
  0xe0   :  { %v164_v28 = vpop.f32.mrf.mxu0 }
  0xe1   :  { %v165_v29 = vadd.f32 %v164_v28, %v47_v26  ;;  %v3035_v26 = vld [vmem:[%s4325_s5 + $0x5e8] ss:$28 sps:$4 sm:$0xff]   ;;  %v3043_v28 = vld [vmem:[%s4325_s5 + $0x5b4] ss:$28 sps:$4 sm:$0xff]  }
  0xe2   :  { %v166_v30 = vpop.f32.mrf.mxu0 }
  0xe3   :  { %v167_v31 = vadd.f32 %v166_v30, %v51_v27  ;;  %v171_v32 = vmax.f32 %v165_v29, 0.0  ;;  %v3040_v27 = vld [vmem:[%s4325_s5 + $0x234] ss:$28 sps:$4 sm:$0xff]  }
  0xe4   :  { %v168_v33 = vpop.f32.mrf.mxu0  ;;  %v3038_v29 = vld [vmem:[%s4325_s5 + $0x230] ss:$28 sps:$4 sm:$0xff]  }
  0xe5   :  { %v172_v34 = vmax.f32 %v167_v31, 0.0  ;;  %v173_v39 = vpack.c.bf16 %v171_v32, %v171_v32  ;;  %v3041_v30 = vld [vmem:[%s4325_s5 + $0x5b0] ss:$28 sps:$4 sm:$0xff]   ;;  %v3046_v31 = vld [vmem:[%s4325_s5 + $0x1fc] ss:$28 sps:$4 sm:$0xff]  }
  0xe6   :  { %v169_v35 = vpop.f32.mrf.mxu0  ;;  %v3049_v32 = vld [vmem:[%s4325_s5 + $0x57c] ss:$28 sps:$4 sm:$0xff]  }
  0xe7   :  { %v174_v36 = vpack.c.bf16 %v172_v34, %v172_v34  ;;  %v3044_v33 = vld [vmem:[%s4325_s5 + $0x1f8] ss:$28 sps:$4 sm:$0xff]   ;;  %v3052_v35 = vld [vmem:[%s4325_s5 + $0x1c4] ss:$28 sps:$4 sm:$0xff]  }
  0xe8   :  { %v3047_v34 = vld [vmem:[%s4325_s5 + $0x578] ss:$28 sps:$4 sm:$0xff]  }
  0xe9   :  { %613 = vmatprep.mubr.bf16.mxu1 %v174_v36  ;;  %654 = vmatprep.mubr.bf16.mxu0 %v174_v36  ;;  %v3055_v36 = vld [vmem:[%s4325_s5 + $0x544] ss:$28 sps:$4 sm:$0xff]  }
  0xea   :  { %614 = vmatmul.mubr.bf16.vlgmr.msra.gmra.mxu1 %v173_v39  ;;  %655 = vmatmul.mubr.bf16.vlgmr.msra.gmra.mxu0 %v173_v39  ;;  %v3058_v39 = vld [vmem:[%s4325_s5 + $0x194] ss:$28 sps:$4 sm:$0xff]  }
  0xeb   :  { %2117 = vmatpush1.bf16.msra.mxu1 %v2960_v37  ;;  %2158 = vmatpush1.bf16.msra.mxu0 %v2963_v38  ;;  %v3050_v37 = vld [vmem:[%s4325_s5 + $0x1c0] ss:$28 sps:$4 sm:$0xff]  }
  0xec   :  { %2118 = vmatprep.subr.bf16.mxu1 %v2968_v40  ;;  %2159 = vmatprep.subr.bf16.mxu0 %v2971_v41  ;;  %v3053_v38 = vld [vmem:[%s4325_s5 + $0x540] ss:$28 sps:$4 sm:$0xff]   ;;  %v3061_v40 = vld [vmem:[%s4325_s5 + $0x514] ss:$28 sps:$4 sm:$0xff]   ;;  %v251_v41 = vsub.s32 2, %v3575_v22 }
  0xef   :  { %2119 = vmatpush1.bf16.msra.mxu1 %v2966_v42  ;;  %2160 = vmatpush1.bf16.msra.mxu0 %v2969_v43  ;;  %v239_v42 = vld [vmem:[%s4327_s4] sm:$0xf]  ;;  %v255_v43 = vsub.s32 3, %v3575_v22 }
  0xf0   :  { %2120 = vmatprep.subr.bf16.mxu1 %v2974_v44  ;;  %2161 = vmatprep.subr.bf16.mxu0 %v2977_v45  ;;  %v244_v44 = vrot.slane %v239_v42, %v3578_v23  ;;  %v252_v45 = vrot.slane %v239_v42, %v251_v41 }
  0xf3   :  { %2121 = vmatpush1.bf16.msra.mxu1 %v2972_v46  ;;  %2162 = vmatpush1.bf16.msra.mxu0 %v2975_v47  ;;  %v248_v46 = vrot.slane %v239_v42, %v3584_v25  ;;  %v256_v47 = vrot.slane %v239_v42, %v255_v43  ;;  %v3112_v42 = vld [vmem:[%s4325_s5 + $0x31c] ss:$28 sps:$4 sm:$0xff]  }
  0xf4   :  { %2122 = vmatprep.subr.bf16.mxu1 %v2980_v48  ;;  %2163 = vmatprep.subr.bf16.mxu0 %v2983_v49 }
  0xf7   :  { %2123 = vmatpush1.bf16.msra.mxu1 %v2978_v50  ;;  %2164 = vmatpush1.bf16.msra.mxu0 %v2981_v51 }
  0xf8   :  { %2124 = vmatprep.subr.bf16.mxu1 %v2986_v52  ;;  %2165 = vmatprep.subr.bf16.mxu0 %v2989_v53 }
  0xfb   :  { %2125 = vmatpush1.bf16.msra.mxu1 %v2984_v54  ;;  %2166 = vmatpush1.bf16.msra.mxu0 %v2987_v55 }
  0xfc   :  { %2126 = vmatprep.subr.bf16.mxu1 %v2992_v56  ;;  %2167 = vmatprep.subr.bf16.mxu0 %v2995_v57 }
  0xff   :  { %2127 = vmatpush1.bf16.msra.mxu1 %v2990_v58  ;;  %2168 = vmatpush1.bf16.msra.mxu0 %v2993_v59 }
 0x100   :  { %2128 = vmatprep.subr.bf16.mxu1 %v2998_v60  ;;  %2169 = vmatprep.subr.bf16.mxu0 %v3001_v61 }
 0x103   :  { %2129 = vmatpush1.bf16.msra.mxu1 %v2996_v62  ;;  %2170 = vmatpush1.bf16.msra.mxu0 %v2999_v63 }
 0x104   :  { %2130 = vmatprep.subr.bf16.mxu1 %v3004_v0  ;;  %2171 = vmatprep.subr.bf16.mxu0 %v3007_v1 }
 0x107   :  { %2131 = vmatpush1.bf16.msra.mxu1 %v3002_v2  ;;  %2172 = vmatpush1.bf16.msra.mxu0 %v3005_v3  ;;  %v3056_v2 = vld [vmem:[%s4325_s5 + $0x190] ss:$28 sps:$4 sm:$0xff]  }
 0x108   :  { %2132 = vmatprep.subr.bf16.mxu1 %v3010_v4  ;;  %2173 = vmatprep.subr.bf16.mxu0 %v3013_v5  ;;  %v3059_v3 = vld [vmem:[%s4325_s5 + $0x510] ss:$28 sps:$4 sm:$0xff]  }
 0x10b   :  { %2133 = vmatpush2.bf16.msra.mxu1 %v3008_v6  ;;  %2174 = vmatpush2.bf16.msra.mxu0 %v3011_v7  ;;  %v3064_v6 = vld [vmem:[%s4325_s5 + $0x15c] ss:$28 sps:$4 sm:$0xff]  }
 0x10c   :  { %2134 = vmatprep.subr.bf16.mxu1 %v3016_v8  ;;  %2175 = vmatprep.subr.bf16.mxu0 %v3019_v9  ;;  %v3067_v7 = vld [vmem:[%s4325_s5 + $0x4dc] ss:$28 sps:$4 sm:$0xff]  }
 0x10d   :  { %v3062_v8 = vld [vmem:[%s4325_s5 + $0x158] ss:$28 sps:$4 sm:$0xff]  }
 0x10e   :  { %v3065_v9 = vld [vmem:[%s4325_s5 + $0x4d8] ss:$28 sps:$4 sm:$0xff]  }
 0x10f   :  { %2135 = vmatpush2.bf16.msra.mxu1 %v3014_v10  ;;  %2176 = vmatpush2.bf16.msra.mxu0 %v3017_v11  ;;  %v3070_v10 = vld [vmem:[%s4325_s5 + $0x124] ss:$28 sps:$4 sm:$0xff]  }
 0x110   :  { %2136 = vmatprep.subr.bf16.mxu1 %v3022_v12  ;;  %2177 = vmatprep.subr.bf16.mxu0 %v3025_v13  ;;  %v3073_v11 = vld [vmem:[%s4325_s5 + $0x4a4] ss:$28 sps:$4 sm:$0xff]  }
 0x111   :  { %v3068_v12 = vld [vmem:[%s4325_s5 + $0x120] ss:$28 sps:$4 sm:$0xff]  }
 0x112   :  { %v3071_v13 = vld [vmem:[%s4325_s5 + $0x4a0] ss:$28 sps:$4 sm:$0xff]  }
 0x113   :  { %2137 = vmatpush2.bf16.msra.mxu1 %v3020_v14  ;;  %2178 = vmatpush2.bf16.msra.mxu0 %v3023_v15  ;;  %v3076_v14 = vld [vmem:[%s4325_s5 + $0xec] ss:$28 sps:$4 sm:$0xff]  }
 0x114   :  { %2138 = vmatprep.subr.bf16.mxu1 %v3028_v16  ;;  %2179 = vmatprep.subr.bf16.mxu0 %v3031_v17  ;;  %v3079_v15 = vld [vmem:[%s4325_s5 + $0x46c] ss:$28 sps:$4 sm:$0xff]  }
 0x115   :  { %v3074_v16 = vld [vmem:[%s4325_s5 + $0xe8] ss:$28 sps:$4 sm:$0xff]  }
 0x116   :  { %v3077_v17 = vld [vmem:[%s4325_s5 + $0x468] ss:$28 sps:$4 sm:$0xff]  }
 0x117   :  { %2139 = vmatpush2.bf16.msra.mxu1 %v3026_v18  ;;  %2180 = vmatpush2.bf16.msra.mxu0 %v3029_v19  ;;  %v3082_v18 = vld [vmem:[%s4325_s5 + $0xb4] ss:$28 sps:$4 sm:$0xff]  }
 0x118   :  { %2140 = vmatprep.subr.bf16.mxu1 %v3034_v20  ;;  %2181 = vmatprep.subr.bf16.mxu0 %v3037_v21  ;;  %v3085_v19 = vld [vmem:[%s4325_s5 + $0x434] ss:$28 sps:$4 sm:$0xff]  }
 0x119   :  { %v3080_v20 = vld [vmem:[%s4325_s5 + $0xb0] ss:$28 sps:$4 sm:$0xff]  }
 0x11a   :  { %v3083_v21 = vld [vmem:[%s4325_s5 + $0x430] ss:$28 sps:$4 sm:$0xff]  }
 0x11b   :  { %2141 = vmatpush2.bf16.msra.mxu1 %v3032_v24  ;;  %2182 = vmatpush2.bf16.msra.mxu0 %v3035_v26  ;;  %v3088_v24 = vld [vmem:[%s4325_s5 + $0x7c] ss:$28 sps:$4 sm:$0xff]  }
 0x11c   :  { %2142 = vmatprep.subr.bf16.mxu1 %v3040_v27  ;;  %2183 = vmatprep.subr.bf16.mxu0 %v3043_v28  ;;  %v3091_v26 = vld [vmem:[%s4325_s5 + $0x3fc] ss:$28 sps:$4 sm:$0xff]  }
 0x11d   :  { %v3086_v27 = vld [vmem:[%s4325_s5 + $0x78] ss:$28 sps:$4 sm:$0xff]  }
 0x11e   :  { %v3089_v28 = vld [vmem:[%s4325_s5 + $0x3f8] ss:$28 sps:$4 sm:$0xff]  }
 0x11f   :  { %2143 = vmatpush2.bf16.msra.mxu1 %v3038_v29  ;;  %2184 = vmatpush2.bf16.msra.mxu0 %v3041_v30  ;;  %v3094_v29 = vld [vmem:[%s4325_s5 + $0x44] ss:$28 sps:$4 sm:$0xff]  }
 0x120   :  { %2144 = vmatprep.subr.bf16.mxu1 %v3046_v31  ;;  %2185 = vmatprep.subr.bf16.mxu0 %v3049_v32  ;;  %v3097_v30 = vld [vmem:[%s4325_s5 + $0x3c4] ss:$28 sps:$4 sm:$0xff]  }
 0x121   :  { %v3092_v31 = vld [vmem:[%s4325_s5 + $0x40] ss:$28 sps:$4 sm:$0xff]  }
 0x122   :  { %v3095_v32 = vld [vmem:[%s4325_s5 + $0x3c0] ss:$28 sps:$4 sm:$0xff]  }
 0x123   :  { %2145 = vmatpush2.bf16.msra.mxu1 %v3044_v33  ;;  %2186 = vmatpush2.bf16.msra.mxu0 %v3047_v34  ;;  %v3100_v33 = vld [vmem:[%s4325_s5 + $0xc] ss:$28 sps:$4 sm:$0xff]  }
 0x124   :  { %2146 = vmatprep.subr.bf16.mxu1 %v3052_v35  ;;  %2187 = vmatprep.subr.bf16.mxu0 %v3055_v36  ;;  %v3103_v34 = vld [vmem:[%s4325_s5 + $0x38c] ss:$28 sps:$4 sm:$0xff]  }
 0x125   :  { %v3098_v35 = vld [vmem:[%s4325_s5 + $0x8] ss:$28 sps:$4 sm:$0xff]  }
 0x126   :  { %v3101_v36 = vld [vmem:[%s4325_s5 + $0x388] ss:$28 sps:$4 sm:$0xff]  }
 0x127   :  { %2147 = vmatpush2.bf16.msra.mxu1 %v3050_v37  ;;  %2188 = vmatpush2.bf16.msra.mxu0 %v3053_v38  ;;  %v3106_v37 = vld [vmem:[%s4325_s5 + $0x354] ss:$28 sps:$4 sm:$0xff]  }
 0x128   :  { %2198 = vmatprep.subr.bf16.mxu1 %v3058_v39  ;;  %2239 = vmatprep.subr.bf16.mxu0 %v3061_v40  ;;  %v3109_v38 = vld [vmem:[%s4325_s5 + $0x6d4] ss:$28 sps:$4 sm:$0xff]  }
 0x129   :  { %v3104_v39 = vld [vmem:[%s4325_s5 + $0x350] ss:$28 sps:$4 sm:$0xff]  }
 0x12a   :  { %v3107_v40 = vld [vmem:[%s4325_s5 + $0x6d0] ss:$28 sps:$4 sm:$0xff]  }
 0x1aa   :  { %v615_v48 = vpop.f32.mrf.mxu1  ;;  %v656_v49 = vpop.f32.mrf.mxu0 }
 0x1ab   :  { %v616_v50 = vadd.f32 %v615_v48, %v244_v44  ;;  %v657_v51 = vadd.f32 %v656_v49, %v252_v45  ;;  %v3115_v44 = vld [vmem:[%s4325_s5 + $0x69c] ss:$28 sps:$4 sm:$0xff]   ;;  %v3121_v48 = vld [vmem:[%s4325_s5 + $0x664] ss:$28 sps:$4 sm:$0xff]  }
 0x1ac   :  { %v617_v52 = vpop.f32.mrf.mxu1  ;;  %v658_v53 = vpop.f32.mrf.mxu0  ;;  %v3110_v45 = vld [vmem:[%s4325_s5 + $0x318] ss:$28 sps:$4 sm:$0xff]   ;;  %v3116_v49 = vld [vmem:[%s4325_s5 + $0x2e0] ss:$28 sps:$4 sm:$0xff]  }
 0x1ad   :  { %v618_v54 = vadd.f32 %v617_v52, %v248_v46  ;;  %v659_v55 = vadd.f32 %v658_v53, %v256_v47  ;;  %v663_v56 = vmax.f32 %v616_v50, 0.0  ;;  %v665_v57 = vmax.f32 %v657_v51, 0.0  ;;  %v3113_v46 = vld [vmem:[%s4325_s5 + $0x698] ss:$28 sps:$4 sm:$0xff]   ;;  %v3118_v47 = vld [vmem:[%s4325_s5 + $0x2e4] ss:$28 sps:$4 sm:$0xff]  }
 0x1ae   :  { %v619_v58 = vpop.f32.mrf.mxu1  ;;  %v660_v59 = vpop.f32.mrf.mxu0  ;;  %v3119_v50 = vld [vmem:[%s4325_s5 + $0x660] ss:$28 sps:$4 sm:$0xff]   ;;  %v3124_v51 = vld [vmem:[%s4325_s5 + $0x2ac] ss:$28 sps:$4 sm:$0xff]  }
 0x1af   :  { %v664_v60 = vmax.f32 %v618_v54, 0.0  ;;  %v666_v61 = vmax.f32 %v659_v55, 0.0  ;;  %v3801_v4 = vpack.c.bf16 %v663_v56, %v663_v56  ;;  %v3803_v5 = vpack.c.bf16 %v665_v57, %v665_v57  ;;  %v3127_v52 = vld [vmem:[%s4325_s5 + $0x62c] ss:$28 sps:$4 sm:$0xff]   ;;  %v3130_v55 = vld [vmem:[%s4325_s5 + $0x274] ss:$28 sps:$4 sm:$0xff]  }
 0x1b0   :  { %v620_v62 = vpop.f32.mrf.mxu1  ;;  %v661_v63 = vpop.f32.mrf.mxu0  ;;  %v3122_v53 = vld [vmem:[%s4325_s5 + $0x2a8] ss:$28 sps:$4 sm:$0xff]   ;;  %v3133_v56 = vld [vmem:[%s4325_s5 + $0x5f4] ss:$28 sps:$4 sm:$0xff]   ;;  %v3136_v59 = vld [vmem:[%s4325_s5 + $0x23c] ss:$28 sps:$4 sm:$0xff]  }
 0x1b1   :  { %v3791_v0 = vpack.c.bf16 %v664_v60, %v664_v60  ;;  %v3793_v1 = vpack.c.bf16 %v666_v61, %v666_v61  ;;  %v3125_v54 = vld [vmem:[%s4325_s5 + $0x628] ss:$28 sps:$4 sm:$0xff]   ;;  %v3128_v57 = vld [vmem:[%s4325_s5 + $0x270] ss:$28 sps:$4 sm:$0xff]   ;;  %v3139_v60 = vld [vmem:[%s4325_s5 + $0x5bc] ss:$28 sps:$4 sm:$0xff]  }
 0x1b2   :  { %v3131_v58 = vld [vmem:[%s4325_s5 + $0x5f0] ss:$28 sps:$4 sm:$0xff]   ;;  %v3134_v61 = vld [vmem:[%s4325_s5 + $0x238] ss:$28 sps:$4 sm:$0xff]   ;;  %v3142_v63 = vld [vmem:[%s4325_s5 + $0x204] ss:$28 sps:$4 sm:$0xff]  }
 0x1b3   :  { %2148 = vmatprep.mubr.bf16.mxu1 %v3791_v0  ;;  %2189 = vmatprep.mubr.bf16.mxu0 %v3793_v1  ;;  %v3137_v62 = vld [vmem:[%s4325_s5 + $0x5b8] ss:$28 sps:$4 sm:$0xff]  }
 0x1b4   :  { %2149 = vmatmul.mubr.bf16.vlgmr.msra.gmra.mxu1 %v3801_v4  ;;  %2190 = vmatmul.mubr.bf16.vlgmr.msra.gmra.mxu0 %v3803_v5 }
 0x1b5   :  { %2199 = vmatpush1.bf16.msra.mxu1 %v3056_v2  ;;  %2240 = vmatpush1.bf16.msra.mxu0 %v3059_v3  ;;  %v3145_v2 = vld [vmem:[%s4325_s5 + $0x584] ss:$28 sps:$4 sm:$0xff]  }
 0x1b6   :  { %2230 = vmatprep.mubr.bf16.mxu1 %v3791_v0  ;;  %2271 = vmatprep.mubr.bf16.mxu0 %v3793_v1  ;;  %v3140_v3 = vld [vmem:[%s4325_s5 + $0x200] ss:$28 sps:$4 sm:$0xff]  }
 0x1b7   :  { %2200 = vmatprep.subr.bf16.mxu1 %v3064_v6  ;;  %2241 = vmatprep.subr.bf16.mxu0 %v3067_v7  ;;  %v3143_v6 = vld [vmem:[%s4325_s5 + $0x580] ss:$28 sps:$4 sm:$0xff]   ;;  %v3148_v7 = vld [vmem:[%s4325_s5 + $0x1cc] ss:$28 sps:$4 sm:$0xff]  }
 0x1b9   :  { %2201 = vmatpush1.bf16.msra.mxu1 %v3062_v8  ;;  %2242 = vmatpush1.bf16.msra.mxu0 %v3065_v9  ;;  %v3151_v8 = vld [vmem:[%s4325_s5 + $0x54c] ss:$28 sps:$4 sm:$0xff]  }
 0x1ba   :  { %2202 = vmatprep.subr.bf16.mxu1 %v3070_v10  ;;  %2243 = vmatprep.subr.bf16.mxu0 %v3073_v11  ;;  %v3146_v9 = vld [vmem:[%s4325_s5 + $0x1c8] ss:$28 sps:$4 sm:$0xff]   ;;  %v3154_v11 = vld [vmem:[%s4325_s5 + $0x19c] ss:$28 sps:$4 sm:$0xff]  }
 0x1bb   :  { %v3149_v10 = vld [vmem:[%s4325_s5 + $0x548] ss:$28 sps:$4 sm:$0xff]  }
 0x1bd   :  { %2203 = vmatpush1.bf16.msra.mxu1 %v3068_v12  ;;  %2244 = vmatpush1.bf16.msra.mxu0 %v3071_v13  ;;  %v3157_v12 = vld [vmem:[%s4325_s5 + $0x51c] ss:$28 sps:$4 sm:$0xff]  }
 0x1be   :  { %2204 = vmatprep.subr.bf16.mxu1 %v3076_v14  ;;  %2245 = vmatprep.subr.bf16.mxu0 %v3079_v15  ;;  %v3152_v13 = vld [vmem:[%s4325_s5 + $0x198] ss:$28 sps:$4 sm:$0xff]   ;;  %v3160_v15 = vld [vmem:[%s4325_s5 + $0x164] ss:$28 sps:$4 sm:$0xff]  }
 0x1bf   :  { %v3155_v14 = vld [vmem:[%s4325_s5 + $0x518] ss:$28 sps:$4 sm:$0xff]  }
 0x1c1   :  { %2205 = vmatpush1.bf16.msra.mxu1 %v3074_v16  ;;  %2246 = vmatpush1.bf16.msra.mxu0 %v3077_v17  ;;  %v3163_v16 = vld [vmem:[%s4325_s5 + $0x4e4] ss:$28 sps:$4 sm:$0xff]  }
 0x1c2   :  { %2206 = vmatprep.subr.bf16.mxu1 %v3082_v18  ;;  %2247 = vmatprep.subr.bf16.mxu0 %v3085_v19  ;;  %v3158_v17 = vld [vmem:[%s4325_s5 + $0x160] ss:$28 sps:$4 sm:$0xff]   ;;  %v3166_v19 = vld [vmem:[%s4325_s5 + $0x12c] ss:$28 sps:$4 sm:$0xff]  }
 0x1c3   :  { %v3161_v18 = vld [vmem:[%s4325_s5 + $0x4e0] ss:$28 sps:$4 sm:$0xff]  }
 0x1c5   :  { %2207 = vmatpush1.bf16.msra.mxu1 %v3080_v20  ;;  %2248 = vmatpush1.bf16.msra.mxu0 %v3083_v21  ;;  %v3169_v20 = vld [vmem:[%s4325_s5 + $0x4ac] ss:$28 sps:$4 sm:$0xff]  }
 0x1c6   :  { %2208 = vmatprep.subr.bf16.mxu1 %v3088_v24  ;;  %2249 = vmatprep.subr.bf16.mxu0 %v3091_v26  ;;  %v3164_v21 = vld [vmem:[%s4325_s5 + $0x128] ss:$28 sps:$4 sm:$0xff]   ;;  %v3172_v26 = vld [vmem:[%s4325_s5 + $0xf4] ss:$28 sps:$4 sm:$0xff]  }
 0x1c7   :  { %v3167_v24 = vld [vmem:[%s4325_s5 + $0x4a8] ss:$28 sps:$4 sm:$0xff]  }
 0x1c9   :  { %2209 = vmatpush1.bf16.msra.mxu1 %v3086_v27  ;;  %2250 = vmatpush1.bf16.msra.mxu0 %v3089_v28  ;;  %v3175_v27 = vld [vmem:[%s4325_s5 + $0x474] ss:$28 sps:$4 sm:$0xff]  }
 0x1ca   :  { %2210 = vmatprep.subr.bf16.mxu1 %v3094_v29  ;;  %2251 = vmatprep.subr.bf16.mxu0 %v3097_v30  ;;  %v3170_v28 = vld [vmem:[%s4325_s5 + $0xf0] ss:$28 sps:$4 sm:$0xff]   ;;  %v3178_v30 = vld [vmem:[%s4325_s5 + $0xbc] ss:$28 sps:$4 sm:$0xff]  }
 0x1cb   :  { %v3173_v29 = vld [vmem:[%s4325_s5 + $0x470] ss:$28 sps:$4 sm:$0xff]  }
 0x1cd   :  { %2211 = vmatpush1.bf16.msra.mxu1 %v3092_v31  ;;  %2252 = vmatpush1.bf16.msra.mxu0 %v3095_v32  ;;  %v3181_v31 = vld [vmem:[%s4325_s5 + $0x43c] ss:$28 sps:$4 sm:$0xff]  }
 0x1ce   :  { %2212 = vmatprep.subr.bf16.mxu1 %v3100_v33  ;;  %2253 = vmatprep.subr.bf16.mxu0 %v3103_v34  ;;  %v3176_v32 = vld [vmem:[%s4325_s5 + $0xb8] ss:$28 sps:$4 sm:$0xff]   ;;  %v3184_v34 = vld [vmem:[%s4325_s5 + $0x84] ss:$28 sps:$4 sm:$0xff]  }
 0x1cf   :  { %v3179_v33 = vld [vmem:[%s4325_s5 + $0x438] ss:$28 sps:$4 sm:$0xff]  }
 0x1d1   :  { %2213 = vmatpush1.bf16.msra.mxu1 %v3098_v35  ;;  %2254 = vmatpush1.bf16.msra.mxu0 %v3101_v36  ;;  %v3187_v35 = vld [vmem:[%s4325_s5 + $0x404] ss:$28 sps:$4 sm:$0xff]  }
 0x1d2   :  { %2214 = vmatprep.subr.bf16.mxu1 %v3106_v37  ;;  %2255 = vmatprep.subr.bf16.mxu0 %v3109_v38  ;;  %v3182_v36 = vld [vmem:[%s4325_s5 + $0x80] ss:$28 sps:$4 sm:$0xff]   ;;  %v3190_v38 = vld [vmem:[%s4325_s5 + $0x4c] ss:$28 sps:$4 sm:$0xff]  }
 0x1d3   :  { %v3185_v37 = vld [vmem:[%s4325_s5 + $0x400] ss:$28 sps:$4 sm:$0xff]  }
 0x1d5   :  { %2215 = vmatpush2.bf16.msra.mxu1 %v3104_v39  ;;  %2256 = vmatpush2.bf16.msra.mxu0 %v3107_v40  ;;  %v3193_v39 = vld [vmem:[%s4325_s5 + $0x3cc] ss:$28 sps:$4 sm:$0xff]  }
 0x1d6   :  { %2216 = vmatprep.subr.bf16.mxu1 %v3112_v42  ;;  %2257 = vmatprep.subr.bf16.mxu0 %v3115_v44  ;;  %v3188_v40 = vld [vmem:[%s4325_s5 + $0x48] ss:$28 sps:$4 sm:$0xff]   ;;  %v3196_v44 = vld [vmem:[%s4325_s5 + $0x14] ss:$28 sps:$4 sm:$0xff]  }
 0x1d7   :  { %v3191_v42 = vld [vmem:[%s4325_s5 + $0x3c8] ss:$28 sps:$4 sm:$0xff]  }
 0x1d9   :  { %2217 = vmatpush2.bf16.msra.mxu1 %v3110_v45  ;;  %2258 = vmatpush2.bf16.msra.mxu0 %v3113_v46  ;;  %v3199_v45 = vld [vmem:[%s4325_s5 + $0x394] ss:$28 sps:$4 sm:$0xff]  }
 0x1da   :  { %2218 = vmatprep.subr.bf16.mxu1 %v3118_v47  ;;  %2259 = vmatprep.subr.bf16.mxu0 %v3121_v48  ;;  %v3194_v46 = vld [vmem:[%s4325_s5 + $0x10] ss:$28 sps:$4 sm:$0xff]   ;;  %v3202_v48 = vld [vmem:[%s4325_s5 + $0x35c] ss:$28 sps:$4 sm:$0xff]  }
 0x1db   :  { %v3197_v47 = vld [vmem:[%s4325_s5 + $0x390] ss:$28 sps:$4 sm:$0xff]  }
 0x1dd   :  { %2219 = vmatpush2.bf16.msra.mxu1 %v3116_v49  ;;  %2260 = vmatpush2.bf16.msra.mxu0 %v3119_v50  ;;  %v3205_v49 = vld [vmem:[%s4325_s5 + $0x6dc] ss:$28 sps:$4 sm:$0xff]  }
 0x1de   :  { %2220 = vmatprep.subr.bf16.mxu1 %v3124_v51  ;;  %2261 = vmatprep.subr.bf16.mxu0 %v3127_v52  ;;  %v3200_v50 = vld [vmem:[%s4325_s5 + $0x358] ss:$28 sps:$4 sm:$0xff]   ;;  %v3208_v52 = vld [vmem:[%s4325_s5 + $0x324] ss:$28 sps:$4 sm:$0xff]  }
 0x1df   :  { %v3203_v51 = vld [vmem:[%s4325_s5 + $0x6d8] ss:$28 sps:$4 sm:$0xff]  }
 0x1e1   :  { %2221 = vmatpush2.bf16.msra.mxu1 %v3122_v53  ;;  %2262 = vmatpush2.bf16.msra.mxu0 %v3125_v54  ;;  %v3211_v53 = vld [vmem:[%s4325_s5 + $0x6a4] ss:$28 sps:$4 sm:$0xff]  }
 0x1e2   :  { %2222 = vmatprep.subr.bf16.mxu1 %v3130_v55  ;;  %2263 = vmatprep.subr.bf16.mxu0 %v3133_v56  ;;  %v3206_v54 = vld [vmem:[%s4325_s5 + $0x320] ss:$28 sps:$4 sm:$0xff]   ;;  %v3214_v56 = vld [vmem:[%s4325_s5 + $0x2ec] ss:$28 sps:$4 sm:$0xff]  }
 0x1e3   :  { %v3209_v55 = vld [vmem:[%s4325_s5 + $0x6a0] ss:$28 sps:$4 sm:$0xff]  }
 0x1e5   :  { %2223 = vmatpush2.bf16.msra.mxu1 %v3128_v57  ;;  %2264 = vmatpush2.bf16.msra.mxu0 %v3131_v58  ;;  %v3217_v57 = vld [vmem:[%s4325_s5 + $0x66c] ss:$28 sps:$4 sm:$0xff]  }
 0x1e6   :  { %2224 = vmatprep.subr.bf16.mxu1 %v3136_v59  ;;  %2265 = vmatprep.subr.bf16.mxu0 %v3139_v60  ;;  %v3212_v58 = vld [vmem:[%s4325_s5 + $0x2e8] ss:$28 sps:$4 sm:$0xff]   ;;  %v3220_v60 = vld [vmem:[%s4325_s5 + $0x2b4] ss:$28 sps:$4 sm:$0xff]  }
 0x1e7   :  { %v3215_v59 = vld [vmem:[%s4325_s5 + $0x668] ss:$28 sps:$4 sm:$0xff]  }
 0x1e9   :  { %2225 = vmatpush2.bf16.msra.mxu1 %v3134_v61  ;;  %2266 = vmatpush2.bf16.msra.mxu0 %v3137_v62  ;;  %v3223_v61 = vld [vmem:[%s4325_s5 + $0x634] ss:$28 sps:$4 sm:$0xff]  }
 0x1ea   :  { %2226 = vmatprep.subr.bf16.mxu1 %v3142_v63  ;;  %2267 = vmatprep.subr.bf16.mxu0 %v3145_v2  ;;  %v3218_v62 = vld [vmem:[%s4325_s5 + $0x2b0] ss:$28 sps:$4 sm:$0xff]   ;;  %v3226_v2 = vld [vmem:[%s4325_s5 + $0x27c] ss:$28 sps:$4 sm:$0xff]  }
 0x1eb   :  { %v3221_v63 = vld [vmem:[%s4325_s5 + $0x630] ss:$28 sps:$4 sm:$0xff]  }
 0x1ed   :  { %2227 = vmatpush2.bf16.msra.mxu1 %v3140_v3  ;;  %2268 = vmatpush2.bf16.msra.mxu0 %v3143_v6  ;;  %v3229_v3 = vld [vmem:[%s4325_s5 + $0x5fc] ss:$28 sps:$4 sm:$0xff]  }
 0x1ee   :  { %2228 = vmatprep.subr.bf16.mxu1 %v3148_v7  ;;  %2269 = vmatprep.subr.bf16.mxu0 %v3151_v8  ;;  %v3224_v6 = vld [vmem:[%s4325_s5 + $0x278] ss:$28 sps:$4 sm:$0xff]   ;;  %v3232_v8 = vld [vmem:[%s4325_s5 + $0x244] ss:$28 sps:$4 sm:$0xff]  }
 0x1ef   :  { %v3227_v7 = vld [vmem:[%s4325_s5 + $0x5f8] ss:$28 sps:$4 sm:$0xff]  }
 0x1f1   :  { %2229 = vmatpush2.bf16.msra.mxu1 %v3146_v9  ;;  %2270 = vmatpush2.bf16.msra.mxu0 %v3149_v10  ;;  %v3235_v9 = vld [vmem:[%s4325_s5 + $0x5c4] ss:$28 sps:$4 sm:$0xff]  }
 0x1f2   :  { %2280 = vmatprep.subr.bf16.mxu1 %v3154_v11  ;;  %2321 = vmatprep.subr.bf16.mxu0 %v3157_v12  ;;  %v3230_v10 = vld [vmem:[%s4325_s5 + $0x240] ss:$28 sps:$4 sm:$0xff]   ;;  %v3238_v12 = vld [vmem:[%s4325_s5 + $0x20c] ss:$28 sps:$4 sm:$0xff]  }
 0x1f3   :  { %v3233_v11 = vld [vmem:[%s4325_s5 + $0x5c0] ss:$28 sps:$4 sm:$0xff]  }
 0x1f4   :  { %2231 = vmatmul.mubr.bf16.vlgmr.msra.gmra.mxu1 %v3801_v4  ;;  %2272 = vmatmul.mubr.bf16.vlgmr.msra.gmra.mxu0 %v3803_v5 }
 0x1f5   :  { %2281 = vmatpush1.bf16.msra.mxu1 %v3152_v13  ;;  %2312 = vmatprep.mubr.bf16.mxu1 %v3791_v0  ;;  %v3241_v13 = vld [vmem:[%s4325_s5 + $0x58c] ss:$28 sps:$4 sm:$0xff]  }
 0x1f6   :  { %2322 = vmatpush1.bf16.msra.mxu0 %v3155_v14  ;;  %2353 = vmatprep.mubr.bf16.mxu0 %v3793_v1  ;;  %v3236_v14 = vld [vmem:[%s4325_s5 + $0x208] ss:$28 sps:$4 sm:$0xff]  }
 0x1f7   :  { %2282 = vmatprep.subr.bf16.mxu1 %v3160_v15  ;;  %2323 = vmatprep.subr.bf16.mxu0 %v3163_v16  ;;  %v3239_v15 = vld [vmem:[%s4325_s5 + $0x588] ss:$28 sps:$4 sm:$0xff]   ;;  %v3244_v16 = vld [vmem:[%s4325_s5 + $0x1d4] ss:$28 sps:$4 sm:$0xff]  }
 0x1f9   :  { %2283 = vmatpush1.bf16.msra.mxu1 %v3158_v17  ;;  %v3247_v17 = vld [vmem:[%s4325_s5 + $0x554] ss:$28 sps:$4 sm:$0xff]  }
 0x1fa   :  { %2324 = vmatpush1.bf16.msra.mxu0 %v3161_v18  ;;  %2284 = vmatprep.subr.bf16.mxu1 %v3166_v19  ;;  %v3242_v18 = vld [vmem:[%s4325_s5 + $0x1d0] ss:$28 sps:$4 sm:$0xff]  }
 0x1fb   :  { %2325 = vmatprep.subr.bf16.mxu0 %v3169_v20  ;;  %v3245_v19 = vld [vmem:[%s4325_s5 + $0x550] ss:$28 sps:$4 sm:$0xff]   ;;  %v3248_v20 = vld [vmem:[%s4325_s5 + $0x360] ss:$28 sps:$4 sm:$0xff]  }
 0x1fd   :  { %2285 = vmatpush1.bf16.msra.mxu1 %v3164_v21  ;;  %v3249_v21 = vld [vmem:[%s4325_s5 + $0x6e0] ss:$28 sps:$4 sm:$0xff]  }
 0x1fe   :  { %2326 = vmatpush1.bf16.msra.mxu0 %v3167_v24  ;;  %2286 = vmatprep.subr.bf16.mxu1 %v3172_v26  ;;  %v3250_v24 = vld [vmem:[%s4325_s5 + $0x1a0] ss:$28 sps:$4 sm:$0xff]  }
 0x1ff   :  { %2327 = vmatprep.subr.bf16.mxu0 %v3175_v27  ;;  %v3251_v26 = vld [vmem:[%s4325_s5 + $0x520] ss:$28 sps:$4 sm:$0xff]   ;;  %v3252_v27 = vld [vmem:[%s4325_s5 + $0x328] ss:$28 sps:$4 sm:$0xff]  }
 0x201   :  { %2287 = vmatpush1.bf16.msra.mxu1 %v3170_v28  ;;  %v3253_v28 = vld [vmem:[%s4325_s5 + $0x6a8] ss:$28 sps:$4 sm:$0xff]  }
 0x202   :  { %2328 = vmatpush1.bf16.msra.mxu0 %v3173_v29  ;;  %2288 = vmatprep.subr.bf16.mxu1 %v3178_v30  ;;  %v3254_v29 = vld [vmem:[%s4325_s5 + $0x168] ss:$28 sps:$4 sm:$0xff]  }
 0x203   :  { %2329 = vmatprep.subr.bf16.mxu0 %v3181_v31  ;;  %v3255_v30 = vld [vmem:[%s4325_s5 + $0x4e8] ss:$28 sps:$4 sm:$0xff]   ;;  %v3256_v31 = vld [vmem:[%s4325_s5 + $0x2f0] ss:$28 sps:$4 sm:$0xff]  }
 0x205   :  { %2289 = vmatpush1.bf16.msra.mxu1 %v3176_v32  ;;  %v3257_v32 = vld [vmem:[%s4325_s5 + $0x670] ss:$28 sps:$4 sm:$0xff]  }
 0x206   :  { %2330 = vmatpush1.bf16.msra.mxu0 %v3179_v33  ;;  %2290 = vmatprep.subr.bf16.mxu1 %v3184_v34  ;;  %v3259_v33 = vld [vmem:[%s4325_s5 + $0x4b0] ss:$28 sps:$4 sm:$0xff]   ;;  %v3261_v34 = vld [vmem:[%s4325_s5 + $0x638] ss:$28 sps:$4 sm:$0xff]  }
 0x207   :  { %2331 = vmatprep.subr.bf16.mxu0 %v3187_v35  ;;  %v3262_v35 = vld [vmem:[%s4325_s5 + $0xf8] ss:$28 sps:$4 sm:$0xff]  }
 0x209   :  { %2291 = vmatpush1.bf16.msra.mxu1 %v3182_v36  ;;  %v3263_v36 = vld [vmem:[%s4325_s5 + $0x478] ss:$28 sps:$4 sm:$0xff]  }
 0x20a   :  { %2332 = vmatpush1.bf16.msra.mxu0 %v3185_v37  ;;  %2292 = vmatprep.subr.bf16.mxu1 %v3190_v38  ;;  %v3264_v37 = vld [vmem:[%s4325_s5 + $0x280] ss:$28 sps:$4 sm:$0xff]  }
 0x20b   :  { %2333 = vmatprep.subr.bf16.mxu0 %v3193_v39  ;;  %v3265_v38 = vld [vmem:[%s4325_s5 + $0x600] ss:$28 sps:$4 sm:$0xff]  }
 0x20c   :  { %v3266_v39 = vld [vmem:[%s4325_s5 + $0xc0] ss:$28 sps:$4 sm:$0xff]  }
 0x20d   :  { %2293 = vmatpush1.bf16.msra.mxu1 %v3188_v40  ;;  %v3267_v40 = vld [vmem:[%s4325_s5 + $0x440] ss:$28 sps:$4 sm:$0xff]  }
 0x20e   :  { %2334 = vmatpush1.bf16.msra.mxu0 %v3191_v42  ;;  %2294 = vmatprep.subr.bf16.mxu1 %v3196_v44  ;;  %v3268_v42 = vld [vmem:[%s4325_s5 + $0x248] ss:$28 sps:$4 sm:$0xff]  }
 0x20f   :  { %2335 = vmatprep.subr.bf16.mxu0 %v3199_v45  ;;  %v3269_v44 = vld [vmem:[%s4325_s5 + $0x5c8] ss:$28 sps:$4 sm:$0xff]  }
 0x210   :  { %v3270_v45 = vld [vmem:[%s4325_s5 + $0x88] ss:$28 sps:$4 sm:$0xff]  }
 0x211   :  { %2295 = vmatpush1.bf16.msra.mxu1 %v3194_v46  ;;  %v3271_v46 = vld [vmem:[%s4325_s5 + $0x408] ss:$28 sps:$4 sm:$0xff]  }
 0x212   :  { %2336 = vmatpush1.bf16.msra.mxu0 %v3197_v47  ;;  %2296 = vmatprep.subr.bf16.mxu1 %v3202_v48  ;;  %v3272_v47 = vld [vmem:[%s4325_s5 + $0x210] ss:$28 sps:$4 sm:$0xff]  }
 0x213   :  { %2337 = vmatprep.subr.bf16.mxu0 %v3205_v49  ;;  %v3273_v48 = vld [vmem:[%s4325_s5 + $0x590] ss:$28 sps:$4 sm:$0xff]  }
 0x214   :  { %v3274_v49 = vld [vmem:[%s4325_s5 + $0x50] ss:$28 sps:$4 sm:$0xff]  }
 0x215   :  { %2297 = vmatpush2.bf16.msra.mxu1 %v3200_v50  ;;  %v3275_v50 = vld [vmem:[%s4325_s5 + $0x3d0] ss:$28 sps:$4 sm:$0xff]  }
 0x216   :  { %2338 = vmatpush2.bf16.msra.mxu0 %v3203_v51  ;;  %2298 = vmatprep.subr.bf16.mxu1 %v3208_v52  ;;  %v3276_v51 = vld [vmem:[%s4325_s5 + $0x1d8] ss:$28 sps:$4 sm:$0xff]  }
 0x217   :  { %2339 = vmatprep.subr.bf16.mxu0 %v3211_v53  ;;  %v3277_v52 = vld [vmem:[%s4325_s5 + $0x558] ss:$28 sps:$4 sm:$0xff]  }
 0x218   :  { %v3278_v53 = vld [vmem:[%s4325_s5 + $0x18] ss:$28 sps:$4 sm:$0xff]  }
 0x219   :  { %2299 = vmatpush2.bf16.msra.mxu1 %v3206_v54  ;;  %v3279_v54 = vld [vmem:[%s4325_s5 + $0x398] ss:$28 sps:$4 sm:$0xff]  }
 0x21a   :  { %2340 = vmatpush2.bf16.msra.mxu0 %v3209_v55  ;;  %2300 = vmatprep.subr.bf16.mxu1 %v3214_v56  ;;  %v4292_v55 = vld [vmem:[%s4328_s6] sm:$0x7f] }
 0x21b   :  { %2341 = vmatprep.subr.bf16.mxu0 %v3217_v57  ;;  %v932_v56 = vrot.slane %v4292_v55, %v3578_v23  ;;  %v936_v57 = vrot.slane %v4292_v55, %v3584_v25  ;;  %v940_v25 = vrot.slane %v4292_v55, %v251_v41 }
 0x21d   :  { %2301 = vmatpush2.bf16.msra.mxu1 %v3212_v58 }
 0x21e   :  { %2342 = vmatpush2.bf16.msra.mxu0 %v3215_v59  ;;  %2302 = vmatprep.subr.bf16.mxu1 %v3220_v60 }
 0x21f   :  { %2343 = vmatprep.subr.bf16.mxu0 %v3223_v61 }
 0x221   :  { %2303 = vmatpush2.bf16.msra.mxu1 %v3218_v62 }
 0x222   :  { %2344 = vmatpush2.bf16.msra.mxu0 %v3221_v63  ;;  %2304 = vmatprep.subr.bf16.mxu1 %v3226_v2 }
 0x223   :  { %2345 = vmatprep.subr.bf16.mxu0 %v3229_v3 }
 0x225   :  { %2305 = vmatpush2.bf16.msra.mxu1 %v3224_v6 }
 0x226   :  { %2346 = vmatpush2.bf16.msra.mxu0 %v3227_v7  ;;  %2306 = vmatprep.subr.bf16.mxu1 %v3232_v8 }
 0x227   :  { %2347 = vmatprep.subr.bf16.mxu0 %v3235_v9 }
 0x229   :  { %2307 = vmatpush2.bf16.msra.mxu1 %v3230_v10  ;;  %v944_v10 = vrot.slane %v4292_v55, %v255_v43  ;;  %v947_v43 = vsub.s32 4, %v3575_v22 }
 0x22a   :  { %2348 = vmatpush2.bf16.msra.mxu0 %v3233_v11  ;;  %2308 = vmatprep.subr.bf16.mxu1 %v3238_v12 }
 0x22b   :  { %2349 = vmatprep.subr.bf16.mxu0 %v3241_v13 }
 0x22d   :  { %2309 = vmatpush2.bf16.msra.mxu1 %v3236_v14 }
 0x22e   :  { %2350 = vmatpush2.bf16.msra.mxu0 %v3239_v15  ;;  %2310 = vmatprep.subr.bf16.mxu1 %v3244_v16 }
 0x22f   :  { %2351 = vmatprep.subr.bf16.mxu0 %v3247_v17 }
 0x231   :  { %2311 = vmatpush2.bf16.msra.mxu1 %v3242_v18 }
 0x232   :  { %2352 = vmatpush2.bf16.msra.mxu0 %v3245_v19  ;;  %2799 = vmatprep.subr.bf16.mxu1 %v3248_v20 }
 0x233   :  { %2821 = vmatprep.subr.bf16.mxu0 %v3249_v21 }
 0x234   :  { %2313 = vmatmul.mubr.bf16.vlgmr.msra.gmra.mxu1 %v3801_v4 }
 0x235   :  { %2354 = vmatmul.mubr.bf16.vlgmr.msra.gmra.mxu0 %v3803_v5  ;;  %2800 = vmatpush3.bf16.msra.mxu1 %v3250_v24 }
 0x236   :  { %2394 = vmatprep.mubr.bf16.mxu1 %v3791_v0  ;;  %2822 = vmatpush3.bf16.msra.mxu0 %v3251_v26  ;;  %v3258_v0 = vld [vmem:[%s4325_s5 + $0x130] ss:$28 sps:$4 sm:$0xff]  }
 0x237   :  { %2434 = vmatprep.mubr.bf16.mxu0 %v3793_v1  ;;  %2801 = vmatprep.subr.bf16.mxu1 %v3252_v27  ;;  %v3260_v1 = vld [vmem:[%s4325_s5 + $0x2b8] ss:$28 sps:$4 sm:$0xff]  }
 0x238   :  { %2823 = vmatprep.subr.bf16.mxu0 %v3253_v28  ;;  %v951_v28 = vsub.s32 5, %v3575_v22 }
 0x239   :  { %2802 = vmatpush3.bf16.msra.mxu1 %v3254_v29  ;;  %v948_v29 = vrot.slane %v4292_v55, %v947_v43 }
 0x23a   :  { %2824 = vmatpush3.bf16.msra.mxu0 %v3255_v30  ;;  %2803 = vmatprep.subr.bf16.mxu1 %v3256_v31  ;;  %v952_v30 = vrot.slane %v4292_v55, %v951_v28 }
 0x23b   :  { %2825 = vmatprep.subr.bf16.mxu0 %v3257_v32 }
 0x23d   :  { %2804 = vmatpush3.bf16.msra.mxu1 %v3258_v0 }
 0x23e   :  { %2826 = vmatpush3.bf16.msra.mxu0 %v3259_v33  ;;  %2805 = vmatprep.subr.bf16.mxu1 %v3260_v1 }
 0x23f   :  { %2827 = vmatprep.subr.bf16.mxu0 %v3261_v34 }
 0x241   :  { %2806 = vmatpush3.bf16.msra.mxu1 %v3262_v35 }
 0x242   :  { %2828 = vmatpush3.bf16.msra.mxu0 %v3263_v36  ;;  %2807 = vmatprep.subr.bf16.mxu1 %v3264_v37 }
 0x243   :  { %2829 = vmatprep.subr.bf16.mxu0 %v3265_v38 }
 0x245   :  { %2808 = vmatpush3.bf16.msra.mxu1 %v3266_v39 }
 0x246   :  { %2830 = vmatpush3.bf16.msra.mxu0 %v3267_v40  ;;  %2809 = vmatprep.subr.bf16.mxu1 %v3268_v42 }
 0x247   :  { %2831 = vmatprep.subr.bf16.mxu0 %v3269_v44 }
 0x249   :  { %2810 = vmatpush3.bf16.msra.mxu1 %v3270_v45 }
 0x24a   :  { %2832 = vmatpush3.bf16.msra.mxu0 %v3271_v46  ;;  %2811 = vmatprep.subr.bf16.mxu1 %v3272_v47  ;;  %v955_v46 = vsub.s32 6, %v3575_v22 }
 0x24b   :  { %2833 = vmatprep.subr.bf16.mxu0 %v3273_v48 }
 0x24d   :  { %2812 = vmatpush3.bf16.msra.mxu1 %v3274_v49  ;;  %v956_v49 = vrot.slane %v4292_v55, %v955_v46 }
 0x24e   :  { %2834 = vmatpush3.bf16.msra.mxu0 %v3275_v50  ;;  %2813 = vmatprep.subr.bf16.mxu1 %v3276_v51 }
 0x24f   :  { %2835 = vmatprep.subr.bf16.mxu0 %v3277_v52 }
 0x251   :  { %2814 = vmatpush3.bf16.msra.mxu1 %v3278_v53 }
 0x252   :  { %2836 = vmatpush3.bf16.msra.mxu0 %v3279_v54 }
 0x254   :  { %2395 = vmatmul.mubr.bf16.vlgmr.msra.gmra.mxu1 %v3801_v4 }
 0x255   :  { %2435 = vmatmul.mubr.bf16.vlgmr.msra.gmra.mxu0 %v3803_v5 }
 0x274   :  { %v2150_v58 = vpop.f32.mrf.mxu1  ;;  %v2191_v59 = vpop.f32.mrf.mxu0 }
 0x275   :  { %v2151_v60 = vadd.f32 %v2150_v58, %v932_v56 }
 0x276   :  { %v2152_v61 = vpop.f32.mrf.mxu1  ;;  %v2193_v62 = vpop.f32.mrf.mxu0 }
 0x277   :  { %v2192_v63 = vadd.f32 %v2191_v59, %v2151_v60  ;;  %v2153_v4 = vadd.f32 %v2152_v61, %v936_v57 }
 0x278   :  { %v2154_v2 = vpop.f32.mrf.mxu1  ;;  %v2195_v5 = vpop.f32.mrf.mxu0 }
 0x279   :  { %v2194_v3 = vadd.f32 %v2193_v62, %v2153_v4  ;;  %3280 = vtanh.f32 %v2192_v63 }
 0x27a   :  { %v2155_v6 = vpop.f32.mrf.mxu1  ;;  %v2196_v7 = vpop.f32.mrf.mxu0 }
 0x27b   :  { %3282 = vtanh.f32 %v2194_v3 }
 0x286   :  { %v3281_v8 = vpop.eup %3280 }
 0x288   :  { %v3283_v9 = vpop.eup %3282 }
 0x289   :  { %v2795_v23 = vpack.c.bf16 %v3283_v9, %v3281_v8 }
 0x28b   :  { %2478 = vst [vmem:[%s4329_s7] sm:$0xff] %v2795_v23 }
 0x2b4   :  { %v2232_v11 = vpop.f32.mrf.mxu1  ;;  %v2273_v12 = vpop.f32.mrf.mxu0 }
 0x2b5   :  { %v2233_v13 = vadd.f32 %v2232_v11, %v940_v25 }
 0x2b6   :  { %v2234_v14 = vpop.f32.mrf.mxu1  ;;  %v2275_v15 = vpop.f32.mrf.mxu0 }
 0x2b7   :  { %v2274_v16 = vadd.f32 %v2273_v12, %v2233_v13  ;;  %v2235_v17 = vadd.f32 %v2234_v14, %v944_v10 }
 0x2b8   :  { %v2236_v18 = vpop.f32.mrf.mxu1  ;;  %v2277_v19 = vpop.f32.mrf.mxu0 }
 0x2b9   :  { %v2276_v20 = vadd.f32 %v2275_v15, %v2235_v17  ;;  %3284 = vtanh.f32 %v2274_v16 }
 0x2ba   :  { %v2237_v21 = vpop.f32.mrf.mxu1  ;;  %v2278_v24 = vpop.f32.mrf.mxu0 }
 0x2bb   :  { %3286 = vtanh.f32 %v2276_v20 }
 0x2c6   :  { %v3285_v26 = vpop.eup %3284 }
 0x2c8   :  { %v3287_v41 = vpop.eup %3286 }
 0x2c9   :  { %v2796_v27 = vpack.c.bf16 %v3287_v41, %v3285_v26 }
 0x2cb   :  { %2479 = vst [vmem:[%s4329_s7 + $0x8] sm:$0xff] %v2796_v27 }
 0x2f4   :  { %v2314_v31 = vpop.f32.mrf.mxu1 }
 0x2f5   :  { %v2315_v32 = vadd.f32 %v2314_v31, %v948_v29  ;;  %v2355_v0 = vpop.f32.mrf.mxu0 }
 0x2f6   :  { %v2316_v33 = vpop.f32.mrf.mxu1 }
 0x2f7   :  { %v2356_v1 = vadd.f32 %v2355_v0, %v2315_v32  ;;  %v2317_v34 = vadd.f32 %v2316_v33, %v952_v30  ;;  %v2357_v35 = vpop.f32.mrf.mxu0 }
 0x2f8   :  { %v2318_v36 = vpop.f32.mrf.mxu1 }
 0x2f9   :  { %v2358_v37 = vadd.f32 %v2357_v35, %v2317_v34  ;;  %v2359_v38 = vpop.f32.mrf.mxu0  ;;  %3288 = vtanh.f32 %v2356_v1 }
 0x2fa   :  { %v2319_v39 = vpop.f32.mrf.mxu1 }
 0x2fb   :  { %3290 = vtanh.f32 %v2358_v37  ;;  %v2360_v40 = vpop.f32.mrf.mxu0 }
 0x306   :  { %v3289_v42 = vpop.eup %3288 }
 0x308   :  { %v3291_v44 = vpop.eup %3290 }
 0x309   :  { %v2797_v45 = vpack.c.bf16 %v3291_v44, %v3289_v42 }
 0x30b   :  { %2480 = vst [vmem:[%s4329_s7 + $0x10] sm:$0xff] %v2797_v45 }
 0x314   :  { %v2815_v47 = vpop.f32.mrf.mxu1 }
 0x315   :  { %v2837_v48 = vpop.f32.mrf.mxu0 }
 0x316   :  { %v2816_v50 = vpop.f32.mrf.mxu1 }
 0x317   :  { %v2817_v51 = vadd.f32 %v2816_v50, %v2815_v47  ;;  %v2838_v52 = vpop.f32.mrf.mxu0 }
 0x318   :  { %v2818_v53 = vpop.f32.mrf.mxu1  ;;  %v2839_v56 = vadd.f32 %v2838_v52, %v2837_v48 }
 0x319   :  { %v2397_v54 = vadd.f32 %v2817_v51, %v956_v49  ;;  %v2840_v57 = vpop.f32.mrf.mxu0 }
 0x31a   :  { %v2819_v58 = vpop.f32.mrf.mxu1 }
 0x31b   :  { %v2437_v59 = vadd.f32 %v2839_v56, %v2397_v54  ;;  %v2841_v60 = vpop.f32.mrf.mxu0 }
 0x31d   :  { %3292 = vtanh.f32 %v2437_v59 }
 0x32a   :  { %v3293_v61 = vpop.eup %3292 }
 0x32b   :  { %v2798_v62 = vpack.c.bf16 %v3293_v61, %v3293_v61 }
 0x32d   :  { %2482 = vst.msk [vmem:[%s4329_s7 + $0x18] sm:$0xf] %vm2481_vm2, %v2798_v62 }

</bundles_post_ra>
